<compile_context>
chip_gen: v7x
topology: tpu7x:2x2x1
jax: 0.10.0
libtpu: 0.0.40
codegen_flags: <defaults>
</compile_context>

<pallas_src>
import functools

import jax
import jax.numpy as jnp
from jax import lax
from jax.experimental import pallas as pl
from jax.experimental.pallas import tpu as pltpu


def _make_kernel(bn, H, W, C, Cmid, precision):
    """Kernel body for one (bn, H, W*C) lane-dense batch tile."""
    WC = W * C
    WCm = W * Cmid
    Hp = H + 2
    dot = functools.partial(jnp.dot, preferred_element_type=jnp.float32,
                            precision=precision)

    def kernel(x_ref, w1_ref, b1_ref, a1_ref, w2_ref, b2_ref, a2_ref,
               w3_ref, b3_ref, border_ref, o_ref, h1p_ref):
        # ---- PseudoPadV2(1): halo rows only (constant PReLU1(bias1)) --------
        # Left/right halo columns were folded into bias2 in the wrapper, so the
        # scratch carries no column padding.  Filled every step (2 rows, cheap)
        # so it stays correct when the "parallel" axis is split across cores.
        halo = jnp.broadcast_to(border_ref[...].reshape(1, 1, WCm), (bn, 1, WCm))
        h1p_ref[:, 0:1, :] = halo
        h1p_ref[:, Hp - 1:Hp, :] = halo

        # ---- conv1 (1x1, C -> Cmid) + PReLU1: Cin contraction on the MXU ----
        x2d = x_ref[...].reshape(bn * H, WC)       # merge leading dims (free)
        h1 = dot(x2d, w1_ref[...]) + b1_ref[...]
        h1 = jnp.where(h1 >= 0.0, h1, a1_ref[...] * h1)

        # Interior store: full lane width at lane offset 0 (unmasked).
        h1p_ref[:, 1:H + 1, :] = h1.reshape(bn, H, WCm)

        # ---- conv2 (3x3 VALID, Cmid -> Cmid) + PReLU2 ------------------------
        # One block-tridiagonal weight per kh (kw taps folded in the wrapper);
        # per-kh slabs are read straight from the scratch ref (sublane slice,
        # full lane width), no lane-offset slicing.
        acc = dot(h1p_ref[:, 0:H, :].reshape(bn * H, WCm), w2_ref[0])
        for kh in (1, 2):
            slab = h1p_ref[:, kh:kh + H, :].reshape(bn * H, WCm)
            acc = acc + dot(slab, w2_ref[kh])
        h2 = acc + b2_ref[...]          # b2 includes the column-halo correction
        h2 = jnp.where(h2 >= 0.0, h2, a2_ref[...] * h2)

        # ---- conv3 (1x1, Cmid -> C) + residual add ---------------------------
        # PseudoFillV2(0) trim is the identity on a single device.
        h3 = dot(h2, w3_ref[...]) + b3_ref[...]
        o_ref[...] = (x2d + h3).reshape(bn, H, WC)

    return kernel


@functools.partial(jax.jit,
                   static_argnames=("bn", "vmem_limit", "precision_name"))
def _residual_block_impl(x_nchw, w1, b1, a1, w2, b2, a2, w3, b3,
                         *, bn, vmem_limit, precision_name):
    N, C, H, W = x_nchw.shape
    Cmid = w1.shape[0]                       # channels // 2
    f32 = jnp.float32
    precision = getattr(lax.Precision, precision_name)

    # TODO(synk): keep activations NHWC end-to-end in production; these two
    # transposes are standalone HBM round-trips outside the kernel.
    x_flat = jnp.transpose(x_nchw.astype(f32), (0, 2, 3, 1)).reshape(N, H, W * C)

    # Per-pixel channel mixing as block matrices in the lane-dense (rows, W*C)
    # layout.  (For large C use plain (rows, Cin) @ (Cin, Cout) instead.)
    eye_w = jnp.eye(W, dtype=f32)
    w1m = jnp.kron(eye_w, w1[:, :, 0, 0].T.astype(f32))        # (W*C,    W*Cmid)
    w3m = jnp.kron(eye_w, w3[:, :, 0, 0].T.astype(f32))        # (W*Cmid, W*C)

    # conv2: fold the three kw taps into one block-tridiagonal matrix per kh.
    # Input pixel w_in feeds output pixel w_out via tap kw = w_in - w_out + 1.
    def folded_kh(kh):
        return (jnp.kron(jnp.eye(W, k=1, dtype=f32), w2[:, :, kh, 0].T.astype(f32))
                + jnp.kron(eye_w, w2[:, :, kh, 1].T.astype(f32))
                + jnp.kron(jnp.eye(W, k=-1, dtype=f32), w2[:, :, kh, 2].T.astype(f32)))
    w2m = jnp.stack([folded_kh(kh) for kh in range(3)])        # (3, W*Cmid, W*Cmid)

    b1t = jnp.tile(b1.astype(f32), W).reshape(1, W * Cmid)
    a1t = jnp.tile(a1.astype(f32), W).reshape(1, W * Cmid)
    a2t = jnp.tile(a2.astype(f32), W).reshape(1, W * Cmid)
    b3t = jnp.tile(b3.astype(f32), W).reshape(1, W * C)

    # Value of conv1+PReLU1 on the zero halo of tx: c1 = PReLU1(bias1).
    c1 = jnp.where(b1 >= 0, b1, a1 * b1).astype(f32)           # (Cmid,)
    border_t = jnp.tile(c1, W).reshape(1, W * Cmid)            # top/bottom halo rows

    # Left/right halo columns only touch output pixels w_out=0 (via kw=0) and
    # w_out=W-1 (via kw=2), with value c1 for every kh -> fold into bias2.
    left_corr = jnp.sum(c1[None, :, None] * w2[:, :, :, 0].astype(f32), axis=(1, 2))
    right_corr = jnp.sum(c1[None, :, None] * w2[:, :, :, 2].astype(f32), axis=(1, 2))
    b2_eff = jnp.tile(b2.astype(f32), W)
    b2_eff = b2_eff.at[:Cmid].add(left_corr)
    b2_eff = b2_eff.at[(W - 1) * Cmid:].add(right_corr)
    b2t = b2_eff.reshape(1, W * Cmid)

    WC, WCm = W * C, W * Cmid
    kernel = _make_kernel(bn, H, W, C, Cmid, precision)

    out_flat = pl.pallas_call(
        kernel,
        out_shape=jax.ShapeDtypeStruct((N, H, WC), f32),
        grid_spec=pltpu.PrefetchScalarGridSpec(
            num_scalar_prefetch=0,
            grid=(N // bn,),
            in_specs=[
                pl.BlockSpec((bn, H, WC), lambda n: (n, 0, 0)),    # x (lane-dense)
                pl.BlockSpec((WC, WCm), lambda n: (0, 0)),         # conv1 block-diag
                pl.BlockSpec((1, WCm), lambda n: (0, 0)),          # bias1 (tiled)
                pl.BlockSpec((1, WCm), lambda n: (0, 0)),          # alpha1 (tiled)
                pl.BlockSpec((3, WCm, WCm), lambda n: (0, 0, 0)),  # conv2 folded kh
                pl.BlockSpec((1, WCm), lambda n: (0, 0)),          # bias2 (+col halo)
                pl.BlockSpec((1, WCm), lambda n: (0, 0)),          # alpha2 (tiled)
                pl.BlockSpec((WCm, WC), lambda n: (0, 0)),         # conv3 block-diag
                pl.BlockSpec((1, WC), lambda n: (0, 0)),           # bias3 (tiled)
                pl.BlockSpec((1, WCm), lambda n: (0, 0)),          # halo row constant
            ],
            out_specs=pl.BlockSpec((bn, H, WC), lambda n: (n, 0, 0)),
            scratch_shapes=[pltpu.VMEM((bn, H + 2, WCm), f32)],
        ),
        # Residual add is the last consumer of x: write the output in place.
        input_output_aliases={0: 0},
        compiler_params=pltpu.CompilerParams(
            dimension_semantics=("parallel",),
            vmem_limit_bytes=vmem_limit),
    )(x_flat, w1m, b1t, a1t, w2m, b2t, a2t, w3m, b3t, border_t)

    return jnp.transpose(out_flat.reshape(N, H, W, C), (0, 3, 1, 2))   # NCHW


def residual_block(x_nchw, w1, b1, a1, w2, b2, a2, w3, b3):
    """x: (N, C, H, W) f32; conv weights in PyTorch (Cout, Cin, kH, kW) layout;
    a1/a2 are per-channel PReLU slopes."""
    N, C, H, W = map(int, x_nchw.shape)
    Cmid = int(w1.shape[0])
    WC, WCm = W * C, W * Cmid

    # ---- chip-derived tiling: VMEM capacity + TensorCore count --------------
    try:
        vmem_cap = int(pltpu.get_tpu_info().vmem_capacity_bytes)
    except Exception:
        vmem_cap = 64 * 1024 * 1024            # conservative (v7x per-TC)
    try:
        kind = jax.devices()[0].device_kind.lower()
    except Exception:
        kind = ""
    num_tc = 2 if "7" in kind else 1           # v7x: 2 TensorCores per chip

    def vmem_needed(bn):
        x_blk = bn * H * WC * 4
        out_blk = bn * H * WC * 4
        weights = (WC * WCm + 3 * WCm * WCm + WCm * WC + 5 * WCm + WC) * 4
        scratch = bn * (H + 2) * WCm * 4
        live = 4 * bn * H * WCm * 4            # h1 / acc / h2 headroom
        # inputs & outputs are double-buffered by the BlockSpec pipeline
        return 2 * (x_blk + out_blk + weights) + scratch + live

    budget = max(vmem_cap // 4, 4 * 1024 * 1024)
    # >= num_tc "parallel" grid steps so a 2-TC chip keeps both cores busy;
    # on 1-TC chips (v5e/v6e) the whole batch stays in a single grid step.
    bn = max(1, min(N, N // num_tc))
    while bn > 1 and (N % bn != 0 or vmem_needed(bn) > budget):
        bn -= 1
    vmem_limit = int(min(vmem_cap // 2, 64 * 1024 * 1024))
    vmem_limit = max(vmem_limit, 2 * vmem_needed(bn))

    # Prefer 3-pass f32 matmuls (HIGH); fall back to HIGHEST if this Mosaic
    # lowering only accepts DEFAULT/HIGHEST dot precision.
    # TODO(synk): at production sizes move weights/activations to bf16.
    try:
        return _residual_block_impl(x_nchw, w1, b1, a1, w2, b2, a2, w3, b3,
                                    bn=bn, vmem_limit=vmem_limit,
                                    precision_name="HIGH")
    except Exception:
        return _residual_block_impl(x_nchw, w1, b1, a1, w2, b2, a2, w3, b3,
                                    bn=bn, vmem_limit=vmem_limit,
                                    precision_name="HIGHEST")


def reference_nchw(x, w1, b1, a1, w2, b2, a2, w3, b3):
    """Pure-JAX reference of the PyTorch forward pass (NCHW / OIHW)."""
    dn = ('NCHW', 'OIHW', 'NCHW')
    hp = lax.Precision.HIGHEST
    tx = jnp.pad(x, ((0, 0), (0, 0), (1, 1), (1, 1)))
    y = lax.conv_general_dilated(tx, w1, (1, 1), 'VALID',
                                 dimension_numbers=dn, precision=hp)
    y = y + b1[None, :, None, None]
    y = jnp.where(y >= 0, y, a1[None, :, None, None] * y)
    y = lax.conv_general_dilated(y, w2, (1, 1), 'VALID',
                                 dimension_numbers=dn, precision=hp)
    y = y + b2[None, :, None, None]
    y = jnp.where(y >= 0, y, a2[None, :, None, None] * y)
    y = lax.conv_general_dilated(y, w3, (1, 1), 'VALID',
                                 dimension_numbers=dn, precision=hp)
    y = y + b3[None, :, None, None]
    return x + y


if __name__ == "__main__":
    # Small shapes consistent with the module: batch=2, channels=4, spatial=16.
    N, C, H, W = 2, 4, 16, 16
    Cmid = C // 2
    key = jax.random.PRNGKey(0)
    ks = jax.random.split(key, 4)

    x = jax.random.normal(ks[0], (N, C, H, W), dtype=jnp.float32)

    def conv_init(k, cout, cin, kh, kw):
        fan_in = cin * kh * kw
        s = 1.0 / float(fan_in) ** 0.5
        kw_, kb_ = jax.random.split(k)
        w = jax.random.uniform(kw_, (cout, cin, kh, kw), jnp.float32, -s, s)
        b = jax.random.uniform(kb_, (cout,), jnp.float32, -s, s)
        return w, b

    w1, b1 = conv_init(ks[1], Cmid, C, 1, 1)
    w2, b2 = conv_init(ks[2], Cmid, Cmid, 3, 3)
    w3, b3 = conv_init(ks[3], C, Cmid, 1, 1)
    a1 = jnp.full((Cmid,), 0.25, jnp.float32)   # nn.PReLU default init
    a2 = jnp.full((Cmid,), 0.25, jnp.float32)

    out = jax.block_until_ready(residual_block(x, w1, b1, a1, w2, b2, a2, w3, b3))
    ref = jax.block_until_ready(reference_nchw(x, w1, b1, a1, w2, b2, a2, w3, b3))

    assert out.shape == (N, C, H, W)
    assert jnp.allclose(out, ref, atol=1e-3, rtol=1e-3), "mismatch vs JAX reference"

    print("KERNEL_OK")
</pallas_src>

<mosaic_0001>
module attributes {stable_mosaic.version = 11 : i64} {
  func.func @kernel(%arg0: i32, %arg1: memref<2x16x64xf32, #tpu.memory_space<vmem>>, %arg2: memref<64x32xf32, #tpu.memory_space<vmem>>, %arg3: memref<1x32xf32, #tpu.memory_space<vmem>>, %arg4: memref<1x32xf32, #tpu.memory_space<vmem>>, %arg5: memref<3x32x32xf32, #tpu.memory_space<vmem>>, %arg6: memref<1x32xf32, #tpu.memory_space<vmem>>, %arg7: memref<1x32xf32, #tpu.memory_space<vmem>>, %arg8: memref<32x64xf32, #tpu.memory_space<vmem>>, %arg9: memref<1x64xf32, #tpu.memory_space<vmem>>, %arg10: memref<1x32xf32, #tpu.memory_space<vmem>>, %arg11: memref<2x16x64xf32, #tpu.memory_space<vmem>>, %arg12: memref<2x18x32xf32, #tpu.memory_space<vmem>>) attributes {dimension_semantics = [#tpu.dimension_semantics<parallel>], iteration_bounds = array<i64: 1>, scalar_prefetch = 0 : i64, scratch_operands = 1 : i64, tpu.core_type = #tpu.core_type<tc>, window_params = [{transform_indices = @transform_0, window_bounds = array<i64: 2, 16, 64>}, {pipeline_mode = #tpu.pipeline_mode<synchronous>, transform_indices = @transform_1, window_bounds = array<i64: 64, 32>}, {pipeline_mode = #tpu.pipeline_mode<synchronous>, transform_indices = @transform_2, window_bounds = array<i64: 1, 32>}, {pipeline_mode = #tpu.pipeline_mode<synchronous>, transform_indices = @transform_3, window_bounds = array<i64: 1, 32>}, {pipeline_mode = #tpu.pipeline_mode<synchronous>, transform_indices = @transform_4, window_bounds = array<i64: 3, 32, 32>}, {pipeline_mode = #tpu.pipeline_mode<synchronous>, transform_indices = @transform_5, window_bounds = array<i64: 1, 32>}, {pipeline_mode = #tpu.pipeline_mode<synchronous>, transform_indices = @transform_6, window_bounds = array<i64: 1, 32>}, {pipeline_mode = #tpu.pipeline_mode<synchronous>, transform_indices = @transform_7, window_bounds = array<i64: 32, 64>}, {pipeline_mode = #tpu.pipeline_mode<synchronous>, transform_indices = @transform_8, window_bounds = array<i64: 1, 64>}, {pipeline_mode = #tpu.pipeline_mode<synchronous>, transform_indices = @transform_9, window_bounds = array<i64: 1, 32>}, {transform_indices = @transform_10, window_bounds = array<i64: 2, 16, 64>}]} {
    %c0 = arith.constant 0 : index
    %c0_0 = arith.constant 0 : index
    %0 = vector.load %arg10[%c0, %c0_0] : memref<1x32xf32, #tpu.memory_space<vmem>>, vector<1x32xf32>
    %1 = vector.shape_cast %0 : vector<1x32xf32> to vector<1x1x32xf32>
    %2 = vector.shape_cast %1 : vector<1x1x32xf32> to vector<1x1x32xf32>
    %3 = vector.broadcast %2 : vector<1x1x32xf32> to vector<2x1x32xf32>
    %c0_1 = arith.constant 0 : index
    %c0_2 = arith.constant 0 : index
    %c0_3 = arith.constant 0 : index
    %4 = vector.load %arg12[%c0_1, %c0_2, %c0_3] : memref<2x18x32xf32, #tpu.memory_space<vmem>>, vector<2x1x32xf32>
    tpu.vector_store %arg12[%c0_1, %c0_2, %c0_3], %3 {strides = array<i32>} : memref<2x18x32xf32, #tpu.memory_space<vmem>>, vector<2x1x32xf32>,
    %c0_4 = arith.constant 0 : index
    %c17 = arith.constant 17 : index
    %c0_5 = arith.constant 0 : index
    %5 = vector.load %arg12[%c0_4, %c17, %c0_5] : memref<2x18x32xf32, #tpu.memory_space<vmem>>, vector<2x1x32xf32>
    tpu.vector_store %arg12[%c0_4, %c17, %c0_5], %3 {strides = array<i32>} : memref<2x18x32xf32, #tpu.memory_space<vmem>>, vector<2x1x32xf32>,
    %c0_6 = arith.constant 0 : index
    %c0_7 = arith.constant 0 : index
    %c0_8 = arith.constant 0 : index
    %6 = vector.load %arg1[%c0_6, %c0_7, %c0_8] : memref<2x16x64xf32, #tpu.memory_space<vmem>>, vector<2x16x64xf32>
    %7 = vector.shape_cast %6 : vector<2x16x64xf32> to vector<32x64xf32>
    %c0_9 = arith.constant 0 : index
    %c0_10 = arith.constant 0 : index
    %8 = vector.load %arg2[%c0_9, %c0_10] : memref<64x32xf32, #tpu.memory_space<vmem>>, vector<64x32xf32>
    %cst = arith.constant dense<0.000000e+00> : vector<32x32xf32>
    %9 = tpu.matmul %7, %8, %cst {dimension_numbers = #tpu.dot_dimension_numbers<[1], [0], [0], [1], [0, 0, 1, 1], [], []>, precision = #tpu.contract_precision<fp32>} : vector<32x64xf32>, vector<64x32xf32>, vector<32x32xf32> -> vector<32x32xf32>
    %c0_11 = arith.constant 0 : index
    %c0_12 = arith.constant 0 : index
    %10 = vector.load %arg3[%c0_11, %c0_12] : memref<1x32xf32, #tpu.memory_space<vmem>>, vector<1x32xf32>
    %11 = vector.broadcast %10 : vector<1x32xf32> to vector<32x32xf32>
    %12 = arith.addf %9, %11 : vector<32x32xf32>
    %cst_13 = arith.constant 0.000000e+00 : f32
    %13 = vector.broadcast %cst_13 : f32 to vector<32x32xf32>
    %14 = arith.cmpf oge, %12, %13 : vector<32x32xf32>
    %c0_14 = arith.constant 0 : index
    %c0_15 = arith.constant 0 : index
    %15 = vector.load %arg4[%c0_14, %c0_15] : memref<1x32xf32, #tpu.memory_space<vmem>>, vector<1x32xf32>
    %16 = vector.broadcast %15 : vector<1x32xf32> to vector<32x32xf32>
    %17 = arith.mulf %16, %12 : vector<32x32xf32>
    %18 = arith.select %14, %12, %17 : vector<32x32xi1>, vector<32x32xf32>
    %19 = vector.shape_cast %18 : vector<32x32xf32> to vector<2x16x32xf32>
    %c0_16 = arith.constant 0 : index
    %c1 = arith.constant 1 : index
    %c0_17 = arith.constant 0 : index
    %20 = vector.load %arg12[%c0_16, %c1, %c0_17] : memref<2x18x32xf32, #tpu.memory_space<vmem>>, vector<2x16x32xf32>
    tpu.vector_store %arg12[%c0_16, %c1, %c0_17], %19 {strides = array<i32>} : memref<2x18x32xf32, #tpu.memory_space<vmem>>, vector<2x16x32xf32>,
    %c0_18 = arith.constant 0 : index
    %c0_19 = arith.constant 0 : index
    %c0_20 = arith.constant 0 : index
    %21 = vector.load %arg12[%c0_18, %c0_19, %c0_20] : memref<2x18x32xf32, #tpu.memory_space<vmem>>, vector<2x16x32xf32>
    %22 = vector.shape_cast %21 : vector<2x16x32xf32> to vector<32x32xf32>
    %c0_21 = arith.constant 0 : index
    %c0_22 = arith.constant 0 : index
    %c0_23 = arith.constant 0 : index
    %23 = vector.load %arg5[%c0_21, %c0_22, %c0_23] : memref<3x32x32xf32, #tpu.memory_space<vmem>>, vector<1x32x32xf32>
    %24 = vector.shape_cast %23 : vector<1x32x32xf32> to vector<32x32xf32>
    %cst_24 = arith.constant dense<0.000000e+00> : vector<32x32xf32>
    %25 = tpu.matmul %22, %24, %cst_24 {dimension_numbers = #tpu.dot_dimension_numbers<[1], [0], [0], [1], [0, 0, 1, 1], [], []>, precision = #tpu.contract_precision<fp32>} : vector<32x32xf32>, vector<32x32xf32>, vector<32x32xf32> -> vector<32x32xf32>
    %c0_25 = arith.constant 0 : index
    %c1_26 = arith.constant 1 : index
    %c0_27 = arith.constant 0 : index
    %26 = vector.load %arg12[%c0_25, %c1_26, %c0_27] : memref<2x18x32xf32, #tpu.memory_space<vmem>>, vector<2x16x32xf32>
    %27 = vector.shape_cast %26 : vector<2x16x32xf32> to vector<32x32xf32>
    %c1_28 = arith.constant 1 : index
    %c0_29 = arith.constant 0 : index
    %c0_30 = arith.constant 0 : index
    %28 = vector.load %arg5[%c1_28, %c0_29, %c0_30] : memref<3x32x32xf32, #tpu.memory_space<vmem>>, vector<1x32x32xf32>
    %29 = vector.shape_cast %28 : vector<1x32x32xf32> to vector<32x32xf32>
    %cst_31 = arith.constant dense<0.000000e+00> : vector<32x32xf32>
    %30 = tpu.matmul %27, %29, %cst_31 {dimension_numbers = #tpu.dot_dimension_numbers<[1], [0], [0], [1], [0, 0, 1, 1], [], []>, precision = #tpu.contract_precision<fp32>} : vector<32x32xf32>, vector<32x32xf32>, vector<32x32xf32> -> vector<32x32xf32>
    %31 = arith.addf %25, %30 : vector<32x32xf32>
    %c0_32 = arith.constant 0 : index
    %c2 = arith.constant 2 : index
    %c0_33 = arith.constant 0 : index
    %32 = vector.load %arg12[%c0_32, %c2, %c0_33] : memref<2x18x32xf32, #tpu.memory_space<vmem>>, vector<2x16x32xf32>
    %33 = vector.shape_cast %32 : vector<2x16x32xf32> to vector<32x32xf32>
    %c2_34 = arith.constant 2 : index
    %c0_35 = arith.constant 0 : index
    %c0_36 = arith.constant 0 : index
    %34 = vector.load %arg5[%c2_34, %c0_35, %c0_36] : memref<3x32x32xf32, #tpu.memory_space<vmem>>, vector<1x32x32xf32>
    %35 = vector.shape_cast %34 : vector<1x32x32xf32> to vector<32x32xf32>
    %cst_37 = arith.constant dense<0.000000e+00> : vector<32x32xf32>
    %36 = tpu.matmul %33, %35, %cst_37 {dimension_numbers = #tpu.dot_dimension_numbers<[1], [0], [0], [1], [0, 0, 1, 1], [], []>, precision = #tpu.contract_precision<fp32>} : vector<32x32xf32>, vector<32x32xf32>, vector<32x32xf32> -> vector<32x32xf32>
    %37 = arith.addf %31, %36 : vector<32x32xf32>
    %c0_38 = arith.constant 0 : index
    %c0_39 = arith.constant 0 : index
    %38 = vector.load %arg6[%c0_38, %c0_39] : memref<1x32xf32, #tpu.memory_space<vmem>>, vector<1x32xf32>
    %39 = vector.broadcast %38 : vector<1x32xf32> to vector<32x32xf32>
    %40 = arith.addf %37, %39 : vector<32x32xf32>
    %cst_40 = arith.constant 0.000000e+00 : f32
    %41 = vector.broadcast %cst_40 : f32 to vector<32x32xf32>
    %42 = arith.cmpf oge, %40, %41 : vector<32x32xf32>
    %c0_41 = arith.constant 0 : index
    %c0_42 = arith.constant 0 : index
    %43 = vector.load %arg7[%c0_41, %c0_42] : memref<1x32xf32, #tpu.memory_space<vmem>>, vector<1x32xf32>
    %44 = vector.broadcast %43 : vector<1x32xf32> to vector<32x32xf32>
    %45 = arith.mulf %44, %40 : vector<32x32xf32>
    %46 = arith.select %42, %40, %45 : vector<32x32xi1>, vector<32x32xf32>
    %c0_43 = arith.constant 0 : index
    %c0_44 = arith.constant 0 : index
    %47 = vector.load %arg8[%c0_43, %c0_44] : memref<32x64xf32, #tpu.memory_space<vmem>>, vector<32x64xf32>
    %cst_45 = arith.constant dense<0.000000e+00> : vector<32x64xf32>
    %48 = tpu.matmul %46, %47, %cst_45 {dimension_numbers = #tpu.dot_dimension_numbers<[1], [0], [0], [1], [0, 0, 1, 1], [], []>, precision = #tpu.contract_precision<fp32>} : vector<32x32xf32>, vector<32x64xf32>, vector<32x64xf32> -> vector<32x64xf32>
    %c0_46 = arith.constant 0 : index
    %c0_47 = arith.constant 0 : index
    %49 = vector.load %arg9[%c0_46, %c0_47] : memref<1x64xf32, #tpu.memory_space<vmem>>, vector<1x64xf32>
    %50 = vector.broadcast %49 : vector<1x64xf32> to vector<32x64xf32>
    %51 = arith.addf %48, %50 : vector<32x64xf32>
    %52 = arith.addf %7, %51 : vector<32x64xf32>
    %53 = vector.shape_cast %52 : vector<32x64xf32> to vector<2x16x64xf32>
    %c0_48 = arith.constant 0 : index
    %c0_49 = arith.constant 0 : index
    %c0_50 = arith.constant 0 : index
    %54 = vector.load %arg11[%c0_48, %c0_49, %c0_50] : memref<2x16x64xf32, #tpu.memory_space<vmem>>, vector<2x16x64xf32>
    tpu.vector_store %arg11[%c0_48, %c0_49, %c0_50], %53 {strides = array<i32>} : memref<2x16x64xf32, #tpu.memory_space<vmem>>, vector<2x16x64xf32>,
    return
  }
  func.func @transform_0(%arg0: i32) -> (i32, i32, i32) {
    %c0_i32 = arith.constant 0 : i32
    %c0_i32_0 = arith.constant 0 : i32
    %c0_i32_1 = arith.constant 0 : i32
    return %arg0, %c0_i32, %c0_i32_0 : i32, i32, i32
  }
  func.func @transform_1(%arg0: i32) -> (i32, i32) {
    %c0_i32 = arith.constant 0 : i32
    %c0_i32_0 = arith.constant 0 : i32
    %c0_i32_1 = arith.constant 0 : i32
    return %c0_i32, %c0_i32_0 : i32, i32
  }
  func.func @transform_2(%arg0: i32) -> (i32, i32) {
    %c0_i32 = arith.constant 0 : i32
    %c0_i32_0 = arith.constant 0 : i32
    %c0_i32_1 = arith.constant 0 : i32
    return %c0_i32, %c0_i32_0 : i32, i32
  }
  func.func @transform_3(%arg0: i32) -> (i32, i32) {
    %c0_i32 = arith.constant 0 : i32
    %c0_i32_0 = arith.constant 0 : i32
    %c0_i32_1 = arith.constant 0 : i32
    return %c0_i32, %c0_i32_0 : i32, i32
  }
  func.func @transform_4(%arg0: i32) -> (i32, i32, i32) {
    %c0_i32 = arith.constant 0 : i32
    %c0_i32_0 = arith.constant 0 : i32
    %c0_i32_1 = arith.constant 0 : i32
    %c0_i32_2 = arith.constant 0 : i32
    return %c0_i32, %c0_i32_0, %c0_i32_1 : i32, i32, i32
  }
  func.func @transform_5(%arg0: i32) -> (i32, i32) {
    %c0_i32 = arith.constant 0 : i32
    %c0_i32_0 = arith.constant 0 : i32
    %c0_i32_1 = arith.constant 0 : i32
    return %c0_i32, %c0_i32_0 : i32, i32
  }
  func.func @transform_6(%arg0: i32) -> (i32, i32) {
    %c0_i32 = arith.constant 0 : i32
    %c0_i32_0 = arith.constant 0 : i32
    %c0_i32_1 = arith.constant 0 : i32
    return %c0_i32, %c0_i32_0 : i32, i32
  }
  func.func @transform_7(%arg0: i32) -> (i32, i32) {
    %c0_i32 = arith.constant 0 : i32
    %c0_i32_0 = arith.constant 0 : i32
    %c0_i32_1 = arith.constant 0 : i32
    return %c0_i32, %c0_i32_0 : i32, i32
  }
  func.func @transform_8(%arg0: i32) -> (i32, i32) {
    %c0_i32 = arith.constant 0 : i32
    %c0_i32_0 = arith.constant 0 : i32
    %c0_i32_1 = arith.constant 0 : i32
    return %c0_i32, %c0_i32_0 : i32, i32
  }
  func.func @transform_9(%arg0: i32) -> (i32, i32) {
    %c0_i32 = arith.constant 0 : i32
    %c0_i32_0 = arith.constant 0 : i32
    %c0_i32_1 = arith.constant 0 : i32
    return %c0_i32, %c0_i32_0 : i32, i32
  }
  func.func @transform_10(%arg0: i32) -> (i32, i32, i32) {
    %c0_i32 = arith.constant 0 : i32
    %c0_i32_0 = arith.constant 0 : i32
    %c0_i32_1 = arith.constant 0 : i32
    return %arg0, %c0_i32, %c0_i32_0 : i32, i32, i32
  }
}

</mosaic_0001>

<bundles_post_ra>
// kernel: tile.58
= control target key start
LH: loop header
LB: loop body
LE: loop exit
PB: predicated region body
PF: predicated region fallthrough
CT: control target
= control target key end

     0   :  { %s28_s0 = inlined_call_operand.vmem [shape: f32[2], index: 0, kind: input, shape index: {}]   ;;  %s29_s1 = inlined_call_operand.vmem [shape: f32[16,2], index: 1, kind: output, shape index: {}]  }
   0x1   :  { %v4_v0 = vld [vmem:[%s28_s0] ss:$0 sm:$0xff] }
   0x2   :  { %5 = vst [vmem:[%s29_s1] sm:$0xff] %v4_v0  ;;  %8 = vst [vmem:[%s29_s1 + $0x8] sm:$0xff] %v4_v0 }

// kernel: tile.59
= control target key start
LH: loop header
LB: loop body
LE: loop exit
PB: predicated region body
PF: predicated region fallthrough
CT: control target
= control target key end

     0   :  { %s131_s10 = smov 30   ;;  %s132_s11 = smov 26   ;;  %vm3_vm0 = vcmask 15360   ;;  %vm9_vm1 = vcmask 261360   ;;  %vm15_vm2 = vcmask 244960   ;;  %vm21_vm3 = vcmask 228560   ;;  %s207_s0 = inlined_call_operand.vmem [shape: f32[16,2], index: 0, kind: input, shape index: {}]   ;;  %s208_s1 = inlined_call_operand.vmem [shape: f32[32], index: 1, kind: output, shape index: {}]  }
   0x1   :  { %v101_v0 = vld [vmem:[%s207_s0 + $0xf] sm:$0x1]   ;;  %v103_v1 = vld [vmem:[%s207_s0 + $0xd] sm:$0x1]   ;;  %v102_v2 = vld [vmem:[%s207_s0 + $0xe] sm:$0x1]  }
   0x2   :  { %7 = vrot.lane.b32.xlu0 %v101_v0, %s131_s10  ;;  %19 = vrot.lane.b32.xlu1 %v103_v1, %s132_s11  ;;  %v104_v3 = vld [vmem:[%s207_s0 + $0xc] sm:$0x1]   ;;  %s133_s16 = smov 28   ;;  %s134_s17 = smov 24   ;;  %v105_v4 = vld [vmem:[%s207_s0 + $0xb] sm:$0x1]  }
   0x3   :  { %v106_v5 = vld [vmem:[%s207_s0 + $0xa] sm:$0x1]   ;;  %v2_v6 = vld [vmem:[%s207_s0] sm:$0x1]   ;;  %s135_s24 = smov 22   ;;  %s136_s25 = smov 20  }
   0x4   :  { %4 = vst.msk [vmem:[#allocation0] sm:$0x1] %vm3_vm0, %v2_v6   ;;  %v107_v7 = vld [vmem:[%s207_s0 + $0x9] sm:$0x1]   ;;  %v108_v8 = vld [vmem:[%s207_s0 + $0x8] sm:$0x1]  }
   0x5   :  { %s137_s30 = smov 18   ;;  %s138_s2 = smov 16   ;;  %v109_v9 = vld [vmem:[%s207_s0 + $0x7] sm:$0x1]   ;;  %v110_v10 = vld [vmem:[%s207_s0 + $0x6] sm:$0x1]  }
   0x6   :  { %13 = vrot.lane.b32.xlu0 %v102_v2, %s133_s16  ;;  %25 = vrot.lane.b32.xlu1 %v104_v3, %s134_s17  ;;  %s139_s7 = smov 14   ;;  %s140_s8 = smov 12   ;;  %v111_v11 = vld [vmem:[%s207_s0 + $0x5] sm:$0x1]   ;;  %v112_v12 = vld [vmem:[%s207_s0 + $0x4] sm:$0x1]  }
   0x7   :  { %s141_s13 = smov 10   ;;  %s142_s14 = smov 8   ;;  %v113_v13 = vld [vmem:[%s207_s0 + $0x3] sm:$0x1]   ;;  %v114_v14 = vld [vmem:[%s207_s0 + $0x2] sm:$0x1]  }
   0x8   :  { %s143_s19 = smov 6   ;;  %s144_s20 = smov 4   ;;  %v115_v15 = vld [vmem:[%s207_s0 + $0x1] sm:$0x1]   ;;  %vm27_vm4 = vcmask 212160   ;;  %vm33_vm5 = vcmask 195760  }
   0x9   :  { %s145_s0 = smov 2   ;;  %vm39_vm6 = vcmask 179360   ;;  %vm45_vm7 = vcmask 162960   ;;  %vm51_vm8 = vcmask 146560   ;;  %vm57_vm9 = vcmask 130160  }
   0xa   :  { %31 = vrot.lane.b32.xlu0 %v105_v4, %s135_s24  ;;  %37 = vrot.lane.b32.xlu1 %v106_v5, %s136_s25  ;;  %vm63_vm10 = vcmask 113760   ;;  %vm69_vm11 = vcmask 97360   ;;  %vm75_vm12 = vcmask 80960   ;;  %vm81_vm13 = vcmask 64560  }
   0xb   :  { %vm87_vm14 = vcmask 48160   ;;  %vm93_vm15 = vcmask 31760  }
   0xe   :  { %43 = vrot.lane.b32.xlu0 %v107_v7, %s137_s30  ;;  %49 = vrot.lane.b32.xlu1 %v108_v8, %s138_s2 }
  0x12   :  { %55 = vrot.lane.b32.xlu0 %v109_v9, %s139_s7  ;;  %61 = vrot.lane.b32.xlu1 %v110_v10, %s140_s8 }
  0x16   :  { %67 = vrot.lane.b32.xlu0 %v111_v11, %s141_s13  ;;  %73 = vrot.lane.b32.xlu1 %v112_v12, %s142_s14 }
  0x1a   :  { %79 = vrot.lane.b32.xlu0 %v113_v13, %s143_s19  ;;  %85 = vrot.lane.b32.xlu1 %v114_v14, %s144_s20 }
  0x1e   :  { %91 = vrot.lane.b32.xlu0 %v115_v15, %s145_s0 }
  0x74   :  { %v8_v16 = vpop.permute.xlu0 %7   ;;  %v20_v17 = vpop.permute.xlu1 %19  }
  0x75   :  { %10 = vst.msk [vmem:[#allocation0] sm:$0x1] %vm9_vm1, %v8_v16  }
  0x78   :  { %v14_v18 = vpop.permute.xlu0 %13   ;;  %v26_v19 = vpop.permute.xlu1 %25  }
  0x79   :  { %16 = vst.msk [vmem:[#allocation0] sm:$0x1] %vm15_vm2, %v14_v18  }
  0x7a   :  { %22 = vst.msk [vmem:[#allocation0] sm:$0x1] %vm21_vm3, %v20_v17  }
  0x7b   :  { %28 = vst.msk [vmem:[#allocation0] sm:$0x1] %vm27_vm4, %v26_v19  }
  0x7c   :  { %v32_v20 = vpop.permute.xlu0 %31   ;;  %v38_v21 = vpop.permute.xlu1 %37  }
  0x7d   :  { %34 = vst.msk [vmem:[#allocation0] sm:$0x1] %vm33_vm5, %v32_v20  }
  0x7e   :  { %40 = vst.msk [vmem:[#allocation0] sm:$0x1] %vm39_vm6, %v38_v21  }
  0x80   :  { %v44_v22 = vpop.permute.xlu0 %43   ;;  %v50_v23 = vpop.permute.xlu1 %49  }
  0x81   :  { %46 = vst.msk [vmem:[#allocation0] sm:$0x1] %vm45_vm7, %v44_v22  }
  0x82   :  { %52 = vst.msk [vmem:[#allocation0] sm:$0x1] %vm51_vm8, %v50_v23  }
  0x84   :  { %v56_v24 = vpop.permute.xlu0 %55   ;;  %v62_v25 = vpop.permute.xlu1 %61  }
  0x85   :  { %58 = vst.msk [vmem:[#allocation0] sm:$0x1] %vm57_vm9, %v56_v24  }
  0x86   :  { %64 = vst.msk [vmem:[#allocation0] sm:$0x1] %vm63_vm10, %v62_v25  }
  0x88   :  { %v68_v26 = vpop.permute.xlu0 %67   ;;  %v74_v27 = vpop.permute.xlu1 %73  }
  0x89   :  { %70 = vst.msk [vmem:[#allocation0] sm:$0x1] %vm69_vm11, %v68_v26  }
  0x8a   :  { %76 = vst.msk [vmem:[#allocation0] sm:$0x1] %vm75_vm12, %v74_v27  }
  0x8c   :  { %v80_v28 = vpop.permute.xlu0 %79   ;;  %v86_v29 = vpop.permute.xlu1 %85  }
  0x8d   :  { %82 = vst.msk [vmem:[#allocation0] sm:$0x1] %vm81_vm13, %v80_v28  }
  0x8e   :  { %88 = vst.msk [vmem:[#allocation0] sm:$0x1] %vm87_vm14, %v86_v29  }
  0x90   :  { %v92_v30 = vpop.permute.xlu0 %91  }
  0x91   :  { %94 = vst.msk [vmem:[#allocation0] sm:$0x1] %vm93_vm15, %v92_v30  }
  0x98   :  { %v98_v31 = vld [vmem:[#allocation0] sm:$0x1] }
  0x99   :  { %100 = vst [vmem:[%s208_s1] sm:$0x1] %v98_v31 }

// kernel: tile.54
= control target key start
LH: loop header
LB: loop body
LE: loop exit
PB: predicated region body
PF: predicated region fallthrough
CT: control target
= control target key end

     0   :  { %s131_s10 = smov 30   ;;  %s132_s11 = smov 26   ;;  %vm3_vm0 = vcmask 15360   ;;  %vm9_vm1 = vcmask 261360   ;;  %vm15_vm2 = vcmask 244960   ;;  %vm21_vm3 = vcmask 228560   ;;  %s207_s0 = inlined_call_operand.vmem [shape: f32[16,2], index: 0, kind: input, shape index: {}]   ;;  %s208_s1 = inlined_call_operand.vmem [shape: f32[1,32], index: 1, kind: output, shape index: {}]  }
   0x1   :  { %v101_v0 = vld [vmem:[%s207_s0 + $0xf] sm:$0x1]   ;;  %v103_v1 = vld [vmem:[%s207_s0 + $0xd] sm:$0x1]   ;;  %v102_v2 = vld [vmem:[%s207_s0 + $0xe] sm:$0x1]  }
   0x2   :  { %7 = vrot.lane.b32.xlu0 %v101_v0, %s131_s10  ;;  %19 = vrot.lane.b32.xlu1 %v103_v1, %s132_s11  ;;  %v104_v3 = vld [vmem:[%s207_s0 + $0xc] sm:$0x1]   ;;  %s133_s16 = smov 28   ;;  %s134_s17 = smov 24   ;;  %v105_v4 = vld [vmem:[%s207_s0 + $0xb] sm:$0x1]  }
   0x3   :  { %v106_v5 = vld [vmem:[%s207_s0 + $0xa] sm:$0x1]   ;;  %v2_v6 = vld [vmem:[%s207_s0] sm:$0x1]   ;;  %s135_s24 = smov 22   ;;  %s136_s25 = smov 20  }
   0x4   :  { %4 = vst.msk [vmem:[#allocation0] sm:$0x1] %vm3_vm0, %v2_v6   ;;  %v107_v7 = vld [vmem:[%s207_s0 + $0x9] sm:$0x1]   ;;  %v108_v8 = vld [vmem:[%s207_s0 + $0x8] sm:$0x1]  }
   0x5   :  { %s137_s30 = smov 18   ;;  %s138_s2 = smov 16   ;;  %v109_v9 = vld [vmem:[%s207_s0 + $0x7] sm:$0x1]   ;;  %v110_v10 = vld [vmem:[%s207_s0 + $0x6] sm:$0x1]  }
   0x6   :  { %13 = vrot.lane.b32.xlu0 %v102_v2, %s133_s16  ;;  %25 = vrot.lane.b32.xlu1 %v104_v3, %s134_s17  ;;  %s139_s7 = smov 14   ;;  %s140_s8 = smov 12   ;;  %v111_v11 = vld [vmem:[%s207_s0 + $0x5] sm:$0x1]   ;;  %v112_v12 = vld [vmem:[%s207_s0 + $0x4] sm:$0x1]  }
   0x7   :  { %s141_s13 = smov 10   ;;  %s142_s14 = smov 8   ;;  %v113_v13 = vld [vmem:[%s207_s0 + $0x3] sm:$0x1]   ;;  %v114_v14 = vld [vmem:[%s207_s0 + $0x2] sm:$0x1]  }
   0x8   :  { %s143_s19 = smov 6   ;;  %s144_s20 = smov 4   ;;  %v115_v15 = vld [vmem:[%s207_s0 + $0x1] sm:$0x1]   ;;  %vm27_vm4 = vcmask 212160   ;;  %vm33_vm5 = vcmask 195760  }
   0x9   :  { %s145_s0 = smov 2   ;;  %vm39_vm6 = vcmask 179360   ;;  %vm45_vm7 = vcmask 162960   ;;  %vm51_vm8 = vcmask 146560   ;;  %vm57_vm9 = vcmask 130160  }
   0xa   :  { %31 = vrot.lane.b32.xlu0 %v105_v4, %s135_s24  ;;  %37 = vrot.lane.b32.xlu1 %v106_v5, %s136_s25  ;;  %vm63_vm10 = vcmask 113760   ;;  %vm69_vm11 = vcmask 97360   ;;  %vm75_vm12 = vcmask 80960   ;;  %vm81_vm13 = vcmask 64560  }
   0xb   :  { %vm87_vm14 = vcmask 48160   ;;  %vm93_vm15 = vcmask 31760  }
   0xe   :  { %43 = vrot.lane.b32.xlu0 %v107_v7, %s137_s30  ;;  %49 = vrot.lane.b32.xlu1 %v108_v8, %s138_s2 }
  0x12   :  { %55 = vrot.lane.b32.xlu0 %v109_v9, %s139_s7  ;;  %61 = vrot.lane.b32.xlu1 %v110_v10, %s140_s8 }
  0x16   :  { %67 = vrot.lane.b32.xlu0 %v111_v11, %s141_s13  ;;  %73 = vrot.lane.b32.xlu1 %v112_v12, %s142_s14 }
  0x1a   :  { %79 = vrot.lane.b32.xlu0 %v113_v13, %s143_s19  ;;  %85 = vrot.lane.b32.xlu1 %v114_v14, %s144_s20 }
  0x1e   :  { %91 = vrot.lane.b32.xlu0 %v115_v15, %s145_s0 }
  0x74   :  { %v8_v16 = vpop.permute.xlu0 %7   ;;  %v20_v17 = vpop.permute.xlu1 %19  }
  0x75   :  { %10 = vst.msk [vmem:[#allocation0] sm:$0x1] %vm9_vm1, %v8_v16  }
  0x78   :  { %v14_v18 = vpop.permute.xlu0 %13   ;;  %v26_v19 = vpop.permute.xlu1 %25  }
  0x79   :  { %16 = vst.msk [vmem:[#allocation0] sm:$0x1] %vm15_vm2, %v14_v18  }
  0x7a   :  { %22 = vst.msk [vmem:[#allocation0] sm:$0x1] %vm21_vm3, %v20_v17  }
  0x7b   :  { %28 = vst.msk [vmem:[#allocation0] sm:$0x1] %vm27_vm4, %v26_v19  }
  0x7c   :  { %v32_v20 = vpop.permute.xlu0 %31   ;;  %v38_v21 = vpop.permute.xlu1 %37  }
  0x7d   :  { %34 = vst.msk [vmem:[#allocation0] sm:$0x1] %vm33_vm5, %v32_v20  }
  0x7e   :  { %40 = vst.msk [vmem:[#allocation0] sm:$0x1] %vm39_vm6, %v38_v21  }
  0x80   :  { %v44_v22 = vpop.permute.xlu0 %43   ;;  %v50_v23 = vpop.permute.xlu1 %49  }
  0x81   :  { %46 = vst.msk [vmem:[#allocation0] sm:$0x1] %vm45_vm7, %v44_v22  }
  0x82   :  { %52 = vst.msk [vmem:[#allocation0] sm:$0x1] %vm51_vm8, %v50_v23  }
  0x84   :  { %v56_v24 = vpop.permute.xlu0 %55   ;;  %v62_v25 = vpop.permute.xlu1 %61  }
  0x85   :  { %58 = vst.msk [vmem:[#allocation0] sm:$0x1] %vm57_vm9, %v56_v24  }
  0x86   :  { %64 = vst.msk [vmem:[#allocation0] sm:$0x1] %vm63_vm10, %v62_v25  }
  0x88   :  { %v68_v26 = vpop.permute.xlu0 %67   ;;  %v74_v27 = vpop.permute.xlu1 %73  }
  0x89   :  { %70 = vst.msk [vmem:[#allocation0] sm:$0x1] %vm69_vm11, %v68_v26  }
  0x8a   :  { %76 = vst.msk [vmem:[#allocation0] sm:$0x1] %vm75_vm12, %v74_v27  }
  0x8c   :  { %v80_v28 = vpop.permute.xlu0 %79   ;;  %v86_v29 = vpop.permute.xlu1 %85  }
  0x8d   :  { %82 = vst.msk [vmem:[#allocation0] sm:$0x1] %vm81_vm13, %v80_v28  }
  0x8e   :  { %88 = vst.msk [vmem:[#allocation0] sm:$0x1] %vm87_vm14, %v86_v29  }
  0x90   :  { %v92_v30 = vpop.permute.xlu0 %91  }
  0x91   :  { %94 = vst.msk [vmem:[#allocation0] sm:$0x1] %vm93_vm15, %v92_v30  }
  0x98   :  { %v98_v31 = vld [vmem:[#allocation0] sm:$0x1] }
  0x99   :  { %100 = vst [vmem:[%s208_s1] sm:$0x1] %v98_v31 }

// kernel: tile.48
= control target key start
LH: loop header
LB: loop body
LE: loop exit
PB: predicated region body
PF: predicated region fallthrough
CT: control target
= control target key end

     0   :  { %s28_s0 = inlined_call_operand.vmem [shape: f32[4], index: 0, kind: input, shape index: {}]   ;;  %s29_s1 = inlined_call_operand.vmem [shape: f32[16,4], index: 1, kind: output, shape index: {}]  }
   0x1   :  { %v4_v0 = vld [vmem:[%s28_s0] ss:$0 sm:$0xff] }
   0x2   :  { %5 = vst [vmem:[%s29_s1] sm:$0xff] %v4_v0  ;;  %8 = vst [vmem:[%s29_s1 + $0x8] sm:$0xff] %v4_v0 }

// kernel: tile.49
= control target key start
LH: loop header
LB: loop body
LE: loop exit
PB: predicated region body
PF: predicated region fallthrough
CT: control target
= control target key end

     0   :  { %s131_s10 = smov 60   ;;  %s132_s11 = smov 52   ;;  %vm3_vm0 = vcmask 31744   ;;  %vm9_vm1 = vcmask 523744   ;;  %vm15_vm2 = vcmask 490944   ;;  %vm21_vm3 = vcmask 458144   ;;  %s207_s0 = inlined_call_operand.vmem [shape: f32[16,4], index: 0, kind: input, shape index: {}]   ;;  %s208_s1 = inlined_call_operand.vmem [shape: f32[1,64], index: 1, kind: output, shape index: {}]  }
   0x1   :  { %v101_v0 = vld [vmem:[%s207_s0 + $0xf] sm:$0x1]   ;;  %v103_v1 = vld [vmem:[%s207_s0 + $0xd] sm:$0x1]   ;;  %v102_v2 = vld [vmem:[%s207_s0 + $0xe] sm:$0x1]  }
   0x2   :  { %7 = vrot.lane.b32.xlu0 %v101_v0, %s131_s10  ;;  %19 = vrot.lane.b32.xlu1 %v103_v1, %s132_s11  ;;  %v104_v3 = vld [vmem:[%s207_s0 + $0xc] sm:$0x1]   ;;  %s133_s16 = smov 56   ;;  %s134_s17 = smov 48   ;;  %v105_v4 = vld [vmem:[%s207_s0 + $0xb] sm:$0x1]  }
   0x3   :  { %v106_v5 = vld [vmem:[%s207_s0 + $0xa] sm:$0x1]   ;;  %v2_v6 = vld [vmem:[%s207_s0] sm:$0x1]   ;;  %s135_s24 = smov 44   ;;  %s136_s25 = smov 40  }
   0x4   :  { %4 = vst.msk [vmem:[#allocation0] sm:$0x1] %vm3_vm0, %v2_v6   ;;  %v107_v7 = vld [vmem:[%s207_s0 + $0x9] sm:$0x1]   ;;  %v108_v8 = vld [vmem:[%s207_s0 + $0x8] sm:$0x1]  }
   0x5   :  { %s137_s30 = smov 36   ;;  %s138_s2 = smov 32   ;;  %v109_v9 = vld [vmem:[%s207_s0 + $0x7] sm:$0x1]   ;;  %v110_v10 = vld [vmem:[%s207_s0 + $0x6] sm:$0x1]  }
   0x6   :  { %13 = vrot.lane.b32.xlu0 %v102_v2, %s133_s16  ;;  %25 = vrot.lane.b32.xlu1 %v104_v3, %s134_s17  ;;  %s139_s7 = smov 28   ;;  %s140_s8 = smov 24   ;;  %v111_v11 = vld [vmem:[%s207_s0 + $0x5] sm:$0x1]   ;;  %v112_v12 = vld [vmem:[%s207_s0 + $0x4] sm:$0x1]  }
   0x7   :  { %s141_s13 = smov 20   ;;  %s142_s14 = smov 16   ;;  %v113_v13 = vld [vmem:[%s207_s0 + $0x3] sm:$0x1]   ;;  %v114_v14 = vld [vmem:[%s207_s0 + $0x2] sm:$0x1]  }
   0x8   :  { %s143_s19 = smov 12   ;;  %s144_s20 = smov 8   ;;  %v115_v15 = vld [vmem:[%s207_s0 + $0x1] sm:$0x1]   ;;  %vm27_vm4 = vcmask 425344   ;;  %vm33_vm5 = vcmask 392544  }
   0x9   :  { %s145_s0 = smov 4   ;;  %vm39_vm6 = vcmask 359744   ;;  %vm45_vm7 = vcmask 326944   ;;  %vm51_vm8 = vcmask 294144   ;;  %vm57_vm9 = vcmask 261344  }
   0xa   :  { %31 = vrot.lane.b32.xlu0 %v105_v4, %s135_s24  ;;  %37 = vrot.lane.b32.xlu1 %v106_v5, %s136_s25  ;;  %vm63_vm10 = vcmask 228544   ;;  %vm69_vm11 = vcmask 195744   ;;  %vm75_vm12 = vcmask 162944   ;;  %vm81_vm13 = vcmask 130144  }
   0xb   :  { %vm87_vm14 = vcmask 97344   ;;  %vm93_vm15 = vcmask 64544  }
   0xe   :  { %43 = vrot.lane.b32.xlu0 %v107_v7, %s137_s30  ;;  %49 = vrot.lane.b32.xlu1 %v108_v8, %s138_s2 }
  0x12   :  { %55 = vrot.lane.b32.xlu0 %v109_v9, %s139_s7  ;;  %61 = vrot.lane.b32.xlu1 %v110_v10, %s140_s8 }
  0x16   :  { %67 = vrot.lane.b32.xlu0 %v111_v11, %s141_s13  ;;  %73 = vrot.lane.b32.xlu1 %v112_v12, %s142_s14 }
  0x1a   :  { %79 = vrot.lane.b32.xlu0 %v113_v13, %s143_s19  ;;  %85 = vrot.lane.b32.xlu1 %v114_v14, %s144_s20 }
  0x1e   :  { %91 = vrot.lane.b32.xlu0 %v115_v15, %s145_s0 }
  0x74   :  { %v8_v16 = vpop.permute.xlu0 %7   ;;  %v20_v17 = vpop.permute.xlu1 %19  }
  0x75   :  { %10 = vst.msk [vmem:[#allocation0] sm:$0x1] %vm9_vm1, %v8_v16  }
  0x78   :  { %v14_v18 = vpop.permute.xlu0 %13   ;;  %v26_v19 = vpop.permute.xlu1 %25  }
  0x79   :  { %16 = vst.msk [vmem:[#allocation0] sm:$0x1] %vm15_vm2, %v14_v18  }
  0x7a   :  { %22 = vst.msk [vmem:[#allocation0] sm:$0x1] %vm21_vm3, %v20_v17  }
  0x7b   :  { %28 = vst.msk [vmem:[#allocation0] sm:$0x1] %vm27_vm4, %v26_v19  }
  0x7c   :  { %v32_v20 = vpop.permute.xlu0 %31   ;;  %v38_v21 = vpop.permute.xlu1 %37  }
  0x7d   :  { %34 = vst.msk [vmem:[#allocation0] sm:$0x1] %vm33_vm5, %v32_v20  }
  0x7e   :  { %40 = vst.msk [vmem:[#allocation0] sm:$0x1] %vm39_vm6, %v38_v21  }
  0x80   :  { %v44_v22 = vpop.permute.xlu0 %43   ;;  %v50_v23 = vpop.permute.xlu1 %49  }
  0x81   :  { %46 = vst.msk [vmem:[#allocation0] sm:$0x1] %vm45_vm7, %v44_v22  }
  0x82   :  { %52 = vst.msk [vmem:[#allocation0] sm:$0x1] %vm51_vm8, %v50_v23  }
  0x84   :  { %v56_v24 = vpop.permute.xlu0 %55   ;;  %v62_v25 = vpop.permute.xlu1 %61  }
  0x85   :  { %58 = vst.msk [vmem:[#allocation0] sm:$0x1] %vm57_vm9, %v56_v24  }
  0x86   :  { %64 = vst.msk [vmem:[#allocation0] sm:$0x1] %vm63_vm10, %v62_v25  }
  0x88   :  { %v68_v26 = vpop.permute.xlu0 %67   ;;  %v74_v27 = vpop.permute.xlu1 %73  }
  0x89   :  { %70 = vst.msk [vmem:[#allocation0] sm:$0x1] %vm69_vm11, %v68_v26  }
  0x8a   :  { %76 = vst.msk [vmem:[#allocation0] sm:$0x1] %vm75_vm12, %v74_v27  }
  0x8c   :  { %v80_v28 = vpop.permute.xlu0 %79   ;;  %v86_v29 = vpop.permute.xlu1 %85  }
  0x8d   :  { %82 = vst.msk [vmem:[#allocation0] sm:$0x1] %vm81_vm13, %v80_v28  }
  0x8e   :  { %88 = vst.msk [vmem:[#allocation0] sm:$0x1] %vm87_vm14, %v86_v29  }
  0x90   :  { %v92_v30 = vpop.permute.xlu0 %91  }
  0x91   :  { %94 = vst.msk [vmem:[#allocation0] sm:$0x1] %vm93_vm15, %v92_v30  }
  0x98   :  { %v98_v31 = vld [vmem:[#allocation0] sm:$0x1] }
  0x99   :  { %100 = vst [vmem:[%s208_s1] sm:$0x1] %v98_v31 }

// kernel: _residual_block_impl.1
= control target key start
LH: loop header
LB: loop body
LE: loop exit
PB: predicated region body
PF: predicated region fallthrough
CT: control target
= control target key end

     0   :  { %vm60_vm0 = vcmask 523264   ;;  %vm36_vm1 = vcmask 253952   ;;  %vm758_vm3 = vcmask 261120   ;;  %s5158_s1 = inlined_call_operand.vmem [shape: f32[64,32], index: 1, kind: input, shape index: {}]   ;;  %s5159_s0 = inlined_call_operand.vmem [shape: f32[2,16,64], index: 0, kind: input, shape index: {}, may-alias: {0,10}]   ;;  %s5160_s9 = inlined_call_operand.vmem [shape: f32[1,32], index: 9, kind: input, shape index: {}]   ;;  %s5161_s4 = inlined_call_operand.vmem [shape: f32[3,32,32], index: 4, kind: input, shape index: {}]   ;;  %s5162_s2 = inlined_call_operand.vmem [shape: f32[1,32], index: 2, kind: input, shape index: {}]   ;;  %s5163_s3 = inlined_call_operand.vmem [shape: f32[1,32], index: 3, kind: input, shape index: {}]   ;;  %s5164_s7 = inlined_call_operand.vmem [shape: f32[32,64], index: 7, kind: input, shape index: {}]   ;;  %s5165_s5 = inlined_call_operand.vmem [shape: f32[1,32], index: 5, kind: input, shape index: {}]   ;;  %s5166_s6 = inlined_call_operand.vmem [shape: f32[1,32], index: 6, kind: input, shape index: {}]   ;;  %s5167_s8 = inlined_call_operand.vmem [shape: f32[1,64], index: 8, kind: input, shape index: {}]   ;;  %s5168_s10 = inlined_call_operand.vmem [shape: f32[2,16,64], index: 10, kind: output, shape index: {}, may-alias: {0,10}]  }
   0x1   :  { %v45_v0 = vld [vmem:[%s5158_s1] sm:$0xff]  ;;  %v46_v1 = vld [vmem:[%s5158_s1 + $0x8] sm:$0xff]  ;;  %v47_v2 = vld [vmem:[%s5158_s1 + $0x10] sm:$0xff] }
   0x2   :  { %v74_v3 = vand.u32 4294901760, %v45_v0  ;;  %v77_v4 = vand.u32 4294901760, %v46_v1  ;;  %v48_v5 = vld [vmem:[%s5158_s1 + $0x18] sm:$0xff]  ;;  %v80_v6 = vand.u32 4294901760, %v47_v2  ;;  %v49_v7 = vld [vmem:[%s5158_s1 + $0x20] sm:$0xff]  ;;  %v50_v8 = vld [vmem:[%s5158_s1 + $0x28] sm:$0xff] }
   0x3   :  { %v83_v9 = vand.u32 4294901760, %v48_v5  ;;  %v86_v10 = vand.u32 4294901760, %v49_v7  ;;  %v89_v11 = vand.u32 4294901760, %v50_v8  ;;  %v51_v12 = vld [vmem:[%s5158_s1 + $0x30] sm:$0xff]  ;;  %v52_v13 = vld [vmem:[%s5158_s1 + $0x38] sm:$0xff]  ;;  %v41_v14 = vld [vmem:[%s5159_s0] sm:$0xff] }
   0x4   :  { %v4585_v15 = vpack.c.bf16 %v77_v4, %v74_v3  ;;  %v92_v16 = vand.u32 4294901760, %v51_v12  ;;  %v62_v17 = vsel %vm60_vm0, %v41_v14, 0  ;;  %v42_v18 = vld [vmem:[%s5159_s0 + $0x8] sm:$0xff]  ;;  %v95_v20 = vand.u32 4294901760, %v52_v13  ;;  %v43_v41 = vld [vmem:[%s5159_s0 + $0x10] sm:$0xff]  ;;  %v44_v52 = vld [vmem:[%s5159_s0 + $0x18] sm:$0xff] }
   0x5   :  { %v4591_v19 = vpack.c.bf16 %v83_v9, %v80_v6  ;;  %v4593_v21 = vand.u32 4294901760, %v62_v17  ;;  %v4595_v22 = vsub.f32 %v45_v0, %v74_v3  ;;  %v4598_v23 = vpack.c.bf16 %v89_v11, %v86_v10 }
   0x6   :  { %4096 = vmatprep.subr.bf16.mxu0 %v4585_v15  ;;  %v4600_v24 = vsub.f32 %v46_v1, %v77_v4  ;;  %v65_v25 = vsel %vm60_vm0, %v42_v18, 0  ;;  %v4603_v26 = vsub.f32 %v47_v2, %v80_v6  ;;  %v4612_v30 = vsub.f32 %v48_v5, %v83_v9 }
   0x7   :  { %4098 = vmatpush3.bf16.msra.mxu0 %v4585_v15  ;;  %v4607_v27 = vsub.f32 %v62_v17, %v4593_v21  ;;  %v189_v28 = vand.u32 4294901760, %v4595_v22  ;;  %v4610_v29 = vand.u32 4294901760, %v65_v25  ;;  %v4617_v33 = vsub.f32 %v49_v7, %v86_v10 }
   0x8   :  { %4100 = vmatprep.subr.bf16.mxu0 %v4591_v19  ;;  %v196_v31 = vand.u32 4294901760, %v4600_v24  ;;  %v203_v32 = vand.u32 4294901760, %v4603_v26  ;;  %v4619_v34 = vsub.f32 %v50_v8, %v89_v11  ;;  %v210_v38 = vand.u32 4294901760, %v4612_v30 }
   0x9   :  { %v148_v35 = vand.u32 4294901760, %v4607_v27  ;;  %v190_v36 = vsub.f32 %v4595_v22, %v189_v28  ;;  %v4626_v37 = vsub.f32 %v65_v25, %v4610_v29  ;;  %v217_v40 = vand.u32 4294901760, %v4617_v33 }
   0xa   :  { %v197_v39 = vsub.f32 %v4600_v24, %v196_v31  ;;  %v204_v44 = vsub.f32 %v4603_v26, %v203_v32  ;;  %v224_v45 = vand.u32 4294901760, %v4619_v34  ;;  %v4646_v46 = vpack.c.bf16 %v95_v20, %v92_v16 }
   0xb   :  { %4102 = vmatpush3.bf16.msra.mxu0 %v4591_v19  ;;  %v149_v42 = vsub.f32 %v4607_v27, %v148_v35  ;;  %v158_v43 = vand.u32 4294901760, %v4626_v37  ;;  %v191_v47 = vand.u32 4294901760, %v190_v36  ;;  %v211_v49 = vsub.f32 %v4612_v30, %v210_v38 }
   0xc   :  { %4104 = vmatprep.subr.bf16.mxu0 %v4598_v23  ;;  %v198_v48 = vand.u32 4294901760, %v197_v39  ;;  %v68_v51 = vsel %vm60_vm0, %v43_v41, 0  ;;  %v218_v54 = vsub.f32 %v4617_v33, %v217_v40  ;;  %v205_v56 = vand.u32 4294901760, %v204_v44 }
   0xd   :  { %v150_v50 = vand.u32 4294901760, %v149_v42  ;;  %v159_v53 = vsub.f32 %v4626_v37, %v158_v43  ;;  %v4661_v55 = vand.u32 4294901760, %v68_v51  ;;  %v225_v57 = vsub.f32 %v4619_v34, %v224_v45 }
   0xe   :  { %v4667_v58 = vsub.f32 %v51_v12, %v92_v16  ;;  %v4669_v59 = vsub.f32 %v52_v13, %v95_v20  ;;  %v4111_v60 = vpack.c.bf16 %v198_v48, %v191_v47  ;;  %v212_v61 = vand.u32 4294901760, %v211_v49 }
   0xf   :  { %4106 = vmatpush3.bf16.msra.mxu0 %v4598_v23  ;;  %3643 = vmatprep.mubr.f32.mxu0 %v150_v50  ;;  %v4673_v62 = vsub.f32 %v68_v51, %v4661_v55  ;;  %v71_v63 = vsel %vm60_vm0, %v44_v52, 0  ;;  %v160_v3 = vand.u32 4294901760, %v159_v53  ;;  %v219_v5 = vand.u32 4294901760, %v218_v54 }
  0x10   :  { %4108 = vmatprep.subr.bf16.mxu0 %v4646_v46  ;;  %v231_v0 = vand.u32 4294901760, %v4667_v58  ;;  %v238_v1 = vand.u32 4294901760, %v4669_v59  ;;  %v4678_v2 = vand.u32 4294901760, %v71_v63  ;;  %v226_v6 = vand.u32 4294901760, %v225_v57 }
  0x11   :  { %v168_v4 = vand.u32 4294901760, %v4673_v62  ;;  %v4115_v8 = vpack.c.bf16 %v212_v61, %v205_v56  ;;  %v4127_v36 = vpack.c.bf16 %v4600_v24, %v4595_v22  ;;  %v4131_v39 = vpack.c.bf16 %v4612_v30, %v4603_v26  ;;  %v3350_v61 = vld [vmem:[%s5162_s2] ss:$0 sm:$0xff] }
  0x12   :  { %v177_v7 = vsub.f32 %v71_v63, %v4678_v2  ;;  %v232_v10 = vsub.f32 %v4667_v58, %v231_v0  ;;  %v239_v11 = vsub.f32 %v4669_v59, %v238_v1  ;;  %v4119_v16 = vpack.c.bf16 %v226_v6, %v219_v5  ;;  %v3351_v63 = vld [vmem:[%s5163_s3] ss:$0 sm:$0xff] }
  0x13   :  { %4110 = vmatpush3.bf16.msra.mxu0 %v4646_v46  ;;  %v169_v9 = vsub.f32 %v4673_v62, %v168_v4  ;;  %v4135_v41 = vpack.c.bf16 %v4619_v34, %v4617_v33  ;;  %v4139_v42 = vpack.c.bf16 %v4669_v59, %v4667_v58  ;;  %v4159_v44 = vpack.c.bf16 %v196_v31, %v189_v28 }
  0x14   :  { %4112 = vmatprep.subr.bf16.mxu0 %v4111_v60  ;;  %v178_v12 = vand.u32 4294901760, %v177_v7  ;;  %v233_v17 = vand.u32 4294901760, %v232_v10  ;;  %v240_v18 = vand.u32 4294901760, %v239_v11  ;;  %v4167_v22 = vpack.c.bf16 %v224_v45, %v217_v40 }
  0x15   :  { %v170_v13 = vand.u32 4294901760, %v169_v9  ;;  %v4171_v24 = vpack.c.bf16 %v238_v1, %v231_v0 }
  0x16   :  { %3644 = vmatmul.mubr.f32.vlgmr.msra.gmra.mrb[0].mxu0 %v160_v3  ;;  %v179_v14 = vsub.f32 %v177_v7, %v178_v12  ;;  %v4123_v25 = vpack.c.bf16 %v240_v18, %v233_v17 }
  0x17   :  { %4114 = vmatpush3.bf16.msra.mxu0 %v4111_v60  ;;  %3646 = vmatprep.mubr.f32.mxu0 %v170_v13 }
  0x18   :  { %4116 = vmatprep.subr.bf16.mxu0 %v4115_v8  ;;  %v180_v20 = vand.u32 4294901760, %v179_v14 }
  0x1a   :  { %3647 = vmatmul.mubr.f32.gmra.mrb[2].mxu0 %v180_v20 }
  0x1b   :  { %4118 = vmatpush3.bf16.msra.mxu0 %v4115_v8  ;;  %3665 = vmatprep.mubr.f32.mxu0 %v4593_v21 }
  0x1c   :  { %4120 = vmatprep.subr.bf16.mxu0 %v4119_v16 }
  0x1f   :  { %4122 = vmatpush3.bf16.msra.mxu0 %v4119_v16 }
  0x20   :  { %4124 = vmatprep.subr.bf16.mxu0 %v4123_v25 }
  0x23   :  { %4126 = vmatpush3.bf16.msra.mxu0 %v4123_v25 }
  0x24   :  { %4128 = vmatprep.subr.bf16.mxu0 %v4127_v36 }
  0x26   :  { %3666 = vmatmul.mubr.f32.vlgmr.msra.gmra.mrb[0].mxu0 %v4610_v29 }
  0x27   :  { %4130 = vmatpush3.bf16.msra.mxu0 %v4127_v36  ;;  %3668 = vmatprep.mubr.f32.mxu0 %v4661_v55 }
  0x28   :  { %4132 = vmatprep.subr.bf16.mxu0 %v4131_v39 }
  0x2a   :  { %3669 = vmatmul.mubr.f32.gmra.mrb[2].mxu0 %v4678_v2 }
  0x2b   :  { %4134 = vmatpush3.bf16.msra.mxu0 %v4131_v39  ;;  %3687 = vmatprep.mubr.f32.mxu0 %v4607_v27  ;;  %v4163_v27 = vpack.c.bf16 %v210_v38, %v203_v32 }
  0x2c   :  { %4136 = vmatprep.subr.bf16.mxu0 %v4135_v41 }
  0x2f   :  { %4138 = vmatpush3.bf16.msra.mxu0 %v4135_v41 }
  0x30   :  { %4140 = vmatprep.subr.bf16.mxu0 %v4139_v42 }
  0x33   :  { %4142 = vmatpush3.bf16.msra.mxu0 %v4139_v42 }
  0x34   :  { %4144 = vmatprep.subr.bf16.mxu0 %v4585_v15 }
  0x36   :  { %3688 = vmatmul.mubr.f32.vlgmr.msra.gmra.mrb[0].mxu0 %v4626_v37 }
  0x37   :  { %4146 = vmatpush3.bf16.msra.mxu0 %v4585_v15  ;;  %3690 = vmatprep.mubr.f32.mxu0 %v4673_v62 }
  0x38   :  { %4148 = vmatprep.subr.bf16.mxu0 %v4591_v19 }
  0x3a   :  { %3691 = vmatmul.mubr.f32.gmra.mrb[2].mxu0 %v177_v7 }
  0x3b   :  { %4150 = vmatpush3.bf16.msra.mxu0 %v4591_v19  ;;  %3709 = vmatprep.mubr.f32.mxu0 %v148_v35 }
  0x3c   :  { %4152 = vmatprep.subr.bf16.mxu0 %v4598_v23 }
  0x3f   :  { %4154 = vmatpush3.bf16.msra.mxu0 %v4598_v23 }
  0x40   :  { %4156 = vmatprep.subr.bf16.mxu0 %v4646_v46 }
  0x43   :  { %4158 = vmatpush3.bf16.msra.mxu0 %v4646_v46 }
  0x44   :  { %4160 = vmatprep.subr.bf16.mxu0 %v4159_v44 }
  0x46   :  { %3710 = vmatmul.mubr.f32.vlgmr.msra.gmra.mrb[0].mxu0 %v158_v43 }
  0x47   :  { %4162 = vmatpush3.bf16.msra.mxu0 %v4159_v44  ;;  %3712 = vmatprep.mubr.f32.mxu0 %v168_v4 }
  0x48   :  { %4164 = vmatprep.subr.bf16.mxu0 %v4163_v27 }
  0x4a   :  { %3713 = vmatmul.mubr.f32.gmra.mrb[2].mxu0 %v178_v12 }
  0x4b   :  { %4166 = vmatpush3.bf16.msra.mxu0 %v4163_v27  ;;  %3731 = vmatprep.mubr.f32.mxu0 %v4593_v21 }
  0x4c   :  { %4168 = vmatprep.subr.bf16.mxu0 %v4167_v22 }
  0x4f   :  { %4170 = vmatpush3.bf16.msra.mxu0 %v4167_v22 }
  0x50   :  { %4172 = vmatprep.subr.bf16.mxu0 %v4171_v24 }
  0x53   :  { %4174 = vmatpush3.bf16.msra.mxu0 %v4171_v24 }
  0x54   :  { %4176 = vmatprep.subr.bf16.mxu0 %v4585_v15 }
  0x56   :  { %3732 = vmatmul.mubr.f32.vlgmr.msra.gmra.mrb[0].mxu0 %v4610_v29 }
  0x57   :  { %4178 = vmatpush3.bf16.msra.mxu0 %v4585_v15  ;;  %3734 = vmatprep.mubr.f32.mxu0 %v4661_v55  ;;  %v35_v15 = vld [vmem:[%s5160_s9] sm:$0x1] }
  0x58   :  { %4180 = vmatprep.subr.bf16.mxu0 %v4591_v19  ;;  %37 = vst.msk [vmem:[#allocation2] sm:$0x1] %vm36_vm1, %v35_v15  ;;  %38 = vst.msk [vmem:[#allocation2 + $0x18] sm:$0x1] %vm36_vm1, %v35_v15 }
  0x59   :  { %39 = vst.msk [vmem:[#allocation2 + $0x11] sm:$0x1] %vm36_vm1, %v35_v15  ;;  %40 = vst.msk [vmem:[#allocation2 + $0x29] sm:$0x1] %vm36_vm1, %v35_v15 }
  0x5a   :  { %3735 = vmatmul.mubr.f32.gmra.mrb[2].mxu0 %v4678_v2 }
  0x5b   :  { %4182 = vmatpush3.bf16.msra.mxu0 %v4591_v19  ;;  %3753 = vmatprep.mubr.f32.mxu0 %v4593_v21  ;;  %v3352_v19 = vld [vmem:[%s5161_s4 + $0x20] sm:$0xff]  ;;  %v3353_v21 = vld [vmem:[%s5161_s4 + $0x28] sm:$0xff] }
  0x5c   :  { %4184 = vmatprep.subr.bf16.mxu0 %v4598_v23  ;;  %v793_v26 = vand.u32 4294901760, %v3352_v19  ;;  %v796_v28 = vand.u32 4294901760, %v3353_v21 }
  0x5e   :  { %v4764_v32 = vpack.c.bf16 %v796_v28, %v793_v26  ;;  %v903_v34 = vsub.f32 %v3352_v19, %v793_v26  ;;  %v910_v35 = vsub.f32 %v3353_v21, %v796_v28 }
  0x5f   :  { %4186 = vmatpush3.bf16.msra.mxu0 %v4598_v23  ;;  %v3354_v23 = vld [vmem:[%s5161_s4 + $0x30] sm:$0xff] }
  0x60   :  { %4188 = vmatprep.subr.bf16.mxu0 %v4646_v46  ;;  %v799_v30 = vand.u32 4294901760, %v3354_v23  ;;  %4192 = vmatprep.subr.bf16.mxu1 %v4764_v32  ;;  %v904_v37 = vand.u32 4294901760, %v903_v34  ;;  %v911_v38 = vand.u32 4294901760, %v910_v35  ;;  %v4777_v57 = vpack.c.bf16 %v910_v35, %v903_v34 }
  0x61   :  { %4194 = vmatpush3.bf16.msra.mxu1 %v4764_v32 }
  0x62   :  { %v905_v40 = vsub.f32 %v903_v34, %v904_v37  ;;  %v912_v43 = vsub.f32 %v910_v35, %v911_v38  ;;  %v917_v45 = vsub.f32 %v3354_v23, %v799_v30  ;;  %v4781_v59 = vpack.c.bf16 %v911_v38, %v904_v37 }
  0x63   :  { %4190 = vmatpush3.bf16.msra.mxu0 %v4646_v46 }
  0x64   :  { %v906_v47 = vand.u32 4294901760, %v905_v40  ;;  %v913_v48 = vand.u32 4294901760, %v912_v43  ;;  %v918_v49 = vand.u32 4294901760, %v917_v45 }
  0x66   :  { %3754 = vmatmul.mubr.f32.vlgmr.msra.gmra.mrb[0].mxu0 %v4610_v29  ;;  %v3355_v29 = vld [vmem:[%s5161_s4 + $0x38] sm:$0xff]  ;;  %v4772_v51 = vpack.c.bf16 %v913_v48, %v906_v47  ;;  %v919_v52 = vsub.f32 %v917_v45, %v918_v49 }
  0x67   :  { %3756 = vmatprep.mubr.f32.mxu0 %v4661_v55  ;;  %v802_v31 = vand.u32 4294901760, %v3355_v29 }
  0x68   :  { %v920_v54 = vand.u32 4294901760, %v919_v52 }
  0x69   :  { %v4766_v33 = vpack.c.bf16 %v802_v31, %v799_v30  ;;  %v924_v46 = vsub.f32 %v3355_v29, %v802_v31 }
  0x6a   :  { %3757 = vmatmul.mubr.f32.gmra.mrb[2].mxu0 %v4678_v2 }
  0x6b   :  { %4196 = vmatprep.subr.bf16.mxu1 %v4766_v33  ;;  %v925_v50 = vand.u32 4294901760, %v924_v46  ;;  %v4779_v58 = vpack.c.bf16 %v924_v46, %v917_v45  ;;  %v767_v45 = vld [vmem:[%s5161_s4] sm:$0xff] }
  0x6c   :  { %4198 = vmatpush3.bf16.msra.mxu1 %v4766_v33  ;;  %v1419_v47 = vand.u32 4294901760, %v767_v45 }
  0x6d   :  { %v926_v53 = vsub.f32 %v924_v46, %v925_v50  ;;  %4200 = vmatprep.subr.bf16.mxu1 %v4772_v51  ;;  %v4783_v60 = vpack.c.bf16 %v925_v50, %v918_v49  ;;  %v768_v46 = vld [vmem:[%s5161_s4 + $0x8] sm:$0xff]  ;;  %v769_v50 = vld [vmem:[%s5161_s4 + $0x10] sm:$0xff] }
  0x6e   :  { %v1422_v48 = vand.u32 4294901760, %v768_v46 }
  0x6f   :  { %v927_v55 = vand.u32 4294901760, %v926_v53 }
  0x71   :  { %v4775_v56 = vpack.c.bf16 %v927_v55, %v920_v54  ;;  %v4841_v54 = vsub.f32 %v767_v45, %v1419_v47  ;;  %v4843_v55 = vsub.f32 %v768_v46, %v1422_v48  ;;  %v3358_v46 = vld [vmem:[%s5161_s4 + $0x50] sm:$0xff] }
 0x139   :  { %v3755_v62 = vpop.f32.mrb[0].mxu0 }
 0x13a   :  { %v4383_v0 = vadd.f32 %v3755_v62, %v3350_v61  ;;  %v717_v1 = vpop.f32.mrb[1].mxu0 }
 0x13b   :  { %v4384_v2 = vadd.f32 %v3350_v61, %v717_v1  ;;  %v1537_v1 = vand.u32 4294901760, %v4843_v55 }
 0x13c   :  { %vm740_vm2 = vcmp.ge.f32.partialorder %v4383_v0, 0.0  ;;  %v751_v3 = vmul.f32 %v4383_v0, %v3351_v63 }
 0x13d   :  { %vm739_vm4 = vcmp.ge.f32.partialorder %v4384_v2, 0.0  ;;  %v750_v4 = vmul.f32 %v4384_v2, %v3351_v63  ;;  %v3758_v5 = vpop.f32.mrb[2].mxu0 }
 0x13e   :  { %v755_v6 = vsel %vm740_vm2, %v4383_v0, %v751_v3  ;;  %v4385_v7 = vadd.f32 %v3758_v5, %v3350_v61  ;;  %v729_v8 = vpop.f32.mrb[3].mxu0 }
 0x13f   :  { %760 = vst.msk [vmem:[#allocation2 + $0x9] sm:$0xff] %vm758_vm3, %v755_v6  ;;  %v754_v9 = vsel %vm739_vm4, %v4384_v2, %v750_v4  ;;  %v4386_v10 = vadd.f32 %v3350_v61, %v729_v8 }
 0x140   :  { %759 = vst.msk [vmem:[#allocation2 + $0x1] sm:$0xff] %vm758_vm3, %v754_v9  ;;  %vm742_vm5 = vcmp.ge.f32.partialorder %v4385_v7, 0.0  ;;  %v753_v11 = vmul.f32 %v4385_v7, %v3351_v63  ;;  %v1538_v9 = vsub.f32 %v4843_v55, %v1537_v1 }
 0x141   :  { %vm741_vm6 = vcmp.ge.f32.partialorder %v4386_v10, 0.0  ;;  %v752_v12 = vmul.f32 %v4386_v10, %v3351_v63 }
 0x142   :  { %v757_v13 = vsel %vm742_vm5, %v4385_v7, %v753_v11  ;;  %v4870_v7 = vpack.c.bf16 %v1422_v48, %v1419_v47  ;;  %v3359_v47 = vld [vmem:[%s5161_s4 + $0x58] sm:$0xff] }
 0x143   :  { %762 = vst.msk [vmem:[#allocation2 + $0x21] sm:$0xff] %vm758_vm3, %v757_v13  ;;  %v756_v14 = vsel %vm741_vm6, %v4386_v10, %v752_v12 }
 0x144   :  { %761 = vst.msk [vmem:[#allocation2 + $0x19] sm:$0xff] %vm758_vm3, %v756_v14 }
 0x146   :  { %v772_v16 = vld [vmem:[#allocation2 + $0x9] sm:$0xff] }
 0x147   :  { %v771_v17 = vld [vmem:[#allocation2 + $0x1] sm:$0xff]  ;;  %v784_v18 = vsel %vm758_vm3, %v772_v16, 0 }
 0x148   :  { %v781_v20 = vsel %vm758_vm3, %v771_v17, 0  ;;  %v4797_v25 = vand.u32 4294901760, %v784_v18  ;;  %v763_v49 = vld [vmem:[#allocation2] sm:$0xff]  ;;  %v764_v53 = vld [vmem:[#allocation2 + $0x8] sm:$0xff] }
 0x149   :  { %v4799_v36 = vand.u32 4294901760, %v781_v20  ;;  %v1407_v52 = vsel %vm758_vm3, %v763_v49, 0  ;;  %v1410_v62 = vsel %vm758_vm3, %v764_v53, 0  ;;  %v2033_v49 = vld [vmem:[#allocation2 + $0xa] sm:$0xff]  ;;  %v2060_v53 = vand.u32 4294901760, %v3358_v46 }
 0x14a   :  { %v872_v39 = vsub.f32 %v784_v18, %v4797_v25  ;;  %v774_v41 = vld [vmem:[#allocation2 + $0x21] sm:$0xff]  ;;  %v4846_v61 = vand.u32 4294901760, %v1407_v52  ;;  %v4855_v2 = vand.u32 4294901760, %v1410_v62  ;;  %v1539_v18 = vand.u32 4294901760, %v1538_v9 }
 0x14b   :  { %v862_v42 = vsub.f32 %v781_v20, %v4799_v36  ;;  %v773_v44 = vld [vmem:[#allocation2 + $0x19] sm:$0xff]  ;;  %v790_v27 = vsel %vm758_vm3, %v774_v41, 0 }
 0x14c   :  { %v873_v22 = vand.u32 4294901760, %v872_v39  ;;  %v787_v24 = vsel %vm758_vm3, %v773_v44, 0  ;;  %v4805_v15 = vand.u32 4294901760, %v790_v27  ;;  %v766_v0 = vld [vmem:[#allocation2 + $0x20] sm:$0xff]  ;;  %v4862_v5 = vsub.f32 %v1407_v52, %v4846_v61 }
 0x14d   :  { %v863_v19 = vand.u32 4294901760, %v862_v42  ;;  %v4807_v21 = vand.u32 4294901760, %v787_v24  ;;  %v4880_v10 = vsub.f32 %v1410_v62, %v4855_v2  ;;  %v2034_v52 = vld [vmem:[#allocation2 + $0x1a] sm:$0xff] }
 0x14e   :  { %v874_v23 = vsub.f32 %v872_v39, %v873_v22  ;;  %v892_v26 = vsub.f32 %v790_v27, %v4805_v15  ;;  %v1489_v13 = vand.u32 4294901760, %v4862_v5 }
 0x14f   :  { %v864_v28 = vsub.f32 %v862_v42, %v863_v19  ;;  %v882_v29 = vsub.f32 %v787_v24, %v4807_v21  ;;  %v1499_v20 = vand.u32 4294901760, %v4880_v10 }
 0x150   :  { %v893_v30 = vand.u32 4294901760, %v892_v26  ;;  %v875_v35 = vand.u32 4294901760, %v874_v23 }
 0x151   :  { %v865_v31 = vand.u32 4294901760, %v864_v28  ;;  %v883_v34 = vand.u32 4294901760, %v882_v29  ;;  %v1500_v27 = vsub.f32 %v4880_v10, %v1499_v20 }
 0x152   :  { %v894_v37 = vsub.f32 %v892_v26, %v893_v30 }
 0x153   :  { %3767 = vmatprep.mubr.f32.mxu1 %v865_v31  ;;  %v884_v38 = vsub.f32 %v882_v29, %v883_v34  ;;  %v4255_v31 = vpack.c.bf16 %v4843_v55, %v4841_v54 }
 0x154   :  { %3768 = vmatmul.mubr.f32.vlgmr.msra.gmra.mrb[0].mxu1 %v875_v35  ;;  %v895_v43 = vand.u32 4294901760, %v894_v37  ;;  %v3356_v35 = vld [vmem:[%s5161_s4 + $0x40] sm:$0xff]  ;;  %v3357_v37 = vld [vmem:[%s5161_s4 + $0x48] sm:$0xff] }
 0x155   :  { %4202 = vmatpush3.bf16.msra.mxu1 %v4772_v51  ;;  %v885_v40 = vand.u32 4294901760, %v884_v38  ;;  %v770_v51 = vld [vmem:[%s5161_s4 + $0x18] sm:$0xff]  ;;  %v2054_v38 = vand.u32 4294901760, %v3356_v35 }
 0x156   :  { %4204 = vmatprep.subr.bf16.mxu1 %v4775_v56 }
 0x157   :  { %3770 = vmatprep.mubr.f32.mxu1 %v885_v40  ;;  %v2057_v40 = vand.u32 4294901760, %v3357_v37 }
 0x158   :  { %3771 = vmatmul.mubr.f32.gmra.mrb[2].mxu1 %v895_v43  ;;  %v2032_v43 = vld [vmem:[#allocation2 + $0x2] sm:$0xff] }
 0x159   :  { %4206 = vmatpush3.bf16.msra.mxu1 %v4775_v56  ;;  %3781 = vmatprep.mubr.f32.mxu1 %v4799_v36  ;;  %v765_v56 = vld [vmem:[#allocation2 + $0x18] sm:$0xff]  ;;  %v2042_v48 = vsel %vm758_vm3, %v2032_v43, 0 }
 0x15a   :  { %4208 = vmatprep.subr.bf16.mxu1 %v4777_v57  ;;  %v1413_v63 = vsel %vm758_vm3, %v765_v56, 0  ;;  %v4959_v55 = vand.u32 4294901760, %v2042_v48  ;;  %v2045_v56 = vsel %vm758_vm3, %v2033_v49, 0 }
 0x15b   :  { %v4864_v6 = vand.u32 4294901760, %v1413_v63 }
 0x15c   :  { %3782 = vmatmul.mubr.f32.vlgmr.msra.gmra.mrb[0].mxu1 %v4797_v25 }
 0x15d   :  { %4210 = vmatpush3.bf16.msra.mxu1 %v4777_v57  ;;  %3784 = vmatprep.mubr.f32.mxu1 %v4807_v21  ;;  %v1425_v57 = vand.u32 4294901760, %v769_v50  ;;  %v4888_v14 = vsub.f32 %v1413_v63, %v4864_v6 }
 0x15e   :  { %4212 = vmatprep.subr.bf16.mxu1 %v4779_v58 }
 0x15f   :  { %v4857_v3 = vsub.f32 %v769_v50, %v1425_v57  ;;  %v4955_v50 = vsub.f32 %v3356_v35, %v2054_v38 }
 0x160   :  { %3785 = vmatmul.mubr.f32.gmra.mrb[2].mxu1 %v4805_v15 }
 0x161   :  { %4214 = vmatpush3.bf16.msra.mxu1 %v4779_v58  ;;  %3795 = vmatprep.mubr.f32.mxu1 %v862_v42  ;;  %v1428_v58 = vand.u32 4294901760, %v770_v51  ;;  %v1544_v11 = vand.u32 4294901760, %v4857_v3  ;;  %v1509_v42 = vand.u32 4294901760, %v4888_v14  ;;  %v2165_v62 = vand.u32 4294901760, %v4955_v50 }
 0x162   :  { %4216 = vmatprep.subr.bf16.mxu1 %v4764_v32 }
 0x163   :  { %v4859_v4 = vsub.f32 %v770_v51, %v1428_v58  ;;  %v4893_v16 = vpack.c.bf16 %v1428_v58, %v1425_v57  ;;  %v4957_v51 = vsub.f32 %v3357_v37, %v2057_v40  ;;  %v2048_v57 = vsel %vm758_vm3, %v2034_v52, 0  ;;  %v2035_v58 = vld [vmem:[#allocation2 + $0x22] sm:$0xff] }
 0x164   :  { %3796 = vmatmul.mubr.f32.vlgmr.msra.gmra.mrb[0].mxu1 %v872_v39  ;;  %v1545_v39 = vsub.f32 %v4857_v3, %v1544_v11 }
 0x165   :  { %4218 = vmatpush3.bf16.msra.mxu1 %v4764_v32  ;;  %3798 = vmatprep.mubr.f32.mxu1 %v882_v29  ;;  %v2172_v63 = vand.u32 4294901760, %v4957_v51 }
 0x166   :  { %4220 = vmatprep.subr.bf16.mxu1 %v4766_v33 }
 0x167   :  { %v2173_v9 = vsub.f32 %v4957_v51, %v2172_v63 }
 0x168   :  { %3799 = vmatmul.mubr.f32.gmra.mrb[2].mxu1 %v892_v26  ;;  %v1510_v26 = vsub.f32 %v4888_v14, %v1509_v42 }
 0x169   :  { %4222 = vmatpush3.bf16.msra.mxu1 %v4766_v33  ;;  %3809 = vmatprep.mubr.f32.mxu1 %v863_v19 }
 0x16a   :  { %4224 = vmatprep.subr.bf16.mxu1 %v4781_v59  ;;  %v1511_v29 = vand.u32 4294901760, %v1510_v26 }
 0x16c   :  { %3810 = vmatmul.mubr.f32.vlgmr.msra.gmra.mrb[0].mxu1 %v873_v22  ;;  %v1546_v22 = vand.u32 4294901760, %v1545_v39 }
 0x16d   :  { %4226 = vmatpush3.bf16.msra.mxu1 %v4781_v59  ;;  %3812 = vmatprep.mubr.f32.mxu1 %v883_v34  ;;  %v1530_v59 = vand.u32 4294901760, %v4841_v54 }
 0x16e   :  { %4228 = vmatprep.subr.bf16.mxu1 %v4783_v60 }
 0x16f   :  { %v1531_v8 = vsub.f32 %v4841_v54, %v1530_v59  ;;  %v4271_v34 = vpack.c.bf16 %v1537_v1, %v1530_v59  ;;  %v2063_v54 = vand.u32 4294901760, %v3359_v47  ;;  %v4969_v59 = vsub.f32 %v3358_v46, %v2060_v53 }
 0x170   :  { %3813 = vmatmul.mubr.f32.gmra.mrb[2].mxu1 %v893_v30 }
 0x171   :  { %4230 = vmatpush3.bf16.msra.mxu1 %v4783_v60  ;;  %3823 = vmatprep.mubr.f32.mxu1 %v4799_v36  ;;  %v1416_v60 = vsel %vm758_vm3, %v766_v0, 0  ;;  %v1532_v17 = vand.u32 4294901760, %v1531_v8  ;;  %v4967_v0 = vand.u32 4294901760, %v2045_v56  ;;  %v4971_v1 = vsub.f32 %v3359_v47, %v2063_v54 }
 0x172   :  { %4232 = vmatprep.subr.bf16.mxu1 %v4764_v32  ;;  %v4884_v12 = vand.u32 4294901760, %v1416_v60  ;;  %v2166_v8 = vsub.f32 %v4955_v50, %v2165_v62 }
 0x173   :  { %v4247_v44 = vpack.c.bf16 %v1539_v18, %v1532_v17  ;;  %v5005_v17 = vpack.c.bf16 %v2063_v54, %v2060_v53 }
 0x174   :  { %3824 = vmatmul.mubr.f32.vlgmr.msra.gmra.mrb[0].mxu1 %v4797_v25  ;;  %v2167_v18 = vand.u32 4294901760, %v2166_v8 }
 0x175   :  { %4234 = vmatpush3.bf16.msra.mxu1 %v4764_v32  ;;  %3826 = vmatprep.mubr.f32.mxu1 %v4807_v21  ;;  %v1551_v32 = vand.u32 4294901760, %v4859_v4 }
 0x176   :  { %4236 = vmatprep.subr.bf16.mxu1 %v4766_v33 }
 0x177   :  { %v1552_v41 = vsub.f32 %v4859_v4, %v1551_v32  ;;  %v4275_v45 = vpack.c.bf16 %v1551_v32, %v1544_v11  ;;  %v2179_v11 = vand.u32 4294901760, %v4969_v59 }
 0x178   :  { %3827 = vmatmul.mubr.f32.gmra.mrb[2].mxu1 %v4805_v15 }
 0x179   :  { %4238 = vmatpush3.bf16.msra.mxu1 %v4766_v33  ;;  %3837 = vmatprep.mubr.f32.mxu1 %v4799_v36  ;;  %v4904_v33 = vsub.f32 %v1416_v60, %v4884_v12  ;;  %v1490_v36 = vsub.f32 %v4862_v5, %v1489_v13  ;;  %v1553_v24 = vand.u32 4294901760, %v1552_v41  ;;  %v4982_v60 = vpack.c.bf16 %v2057_v40, %v2054_v38  ;;  %v2704_v38 = vld [vmem:[%s5164_s7 + $0x18] sm:$0xff] }
 0x17a   :  { %4240 = vmatprep.subr.bf16.mxu1 %v4870_v7  ;;  %v2180_v41 = vsub.f32 %v4969_v59, %v2179_v11  ;;  %v2734_v43 = vand.u32 4294901760, %v2704_v38 }
 0x17b   :  { %v1519_v19 = vand.u32 4294901760, %v4904_v33  ;;  %v1491_v23 = vand.u32 4294901760, %v1490_v36 }
 0x17c   :  { %3838 = vmatmul.mubr.f32.vlgmr.msra.gmra.mrb[0].mxu1 %v4797_v25  ;;  %v1501_v25 = vand.u32 4294901760, %v1500_v27  ;;  %v2181_v27 = vand.u32 4294901760, %v2180_v41  ;;  %v2856_v54 = vsub.f32 %v2704_v38, %v2734_v43 }
 0x17d   :  { %4242 = vmatpush3.bf16.msra.mxu1 %v4870_v7  ;;  %3840 = vmatprep.mubr.f32.mxu1 %v4807_v21  ;;  %v4251_v21 = vpack.c.bf16 %v1553_v24, %v1546_v22  ;;  %v1520_v28 = vsub.f32 %v4904_v33, %v1519_v19 }
 0x17e   :  { %4244 = vmatprep.subr.bf16.mxu1 %v4893_v16 }
 0x17f   :  { %v1521_v30 = vand.u32 4294901760, %v1520_v28  ;;  %v4303_v28 = vpack.c.bf16 %v4957_v51, %v4955_v50 }
 0x180   :  { %3841 = vmatmul.mubr.f32.gmra.mrb[2].mxu1 %v4805_v15  ;;  %v4259_v15 = vpack.c.bf16 %v4859_v4, %v4857_v3  ;;  %v4974_v3 = vsub.f32 %v2042_v48, %v4959_v55  ;;  %v4976_v4 = vand.u32 4294901760, %v2048_v57 }
 0x181   :  { %4246 = vmatpush3.bf16.msra.mxu1 %v4893_v16  ;;  %3851 = vmatprep.mubr.f32.mxu1 %v1491_v23 }
 0x182   :  { %4248 = vmatprep.subr.bf16.mxu1 %v4247_v44 }
 0x184   :  { %3852 = vmatmul.mubr.f32.vlgmr.msra.gmra.mrb[0].mxu1 %v1501_v25 }
 0x185   :  { %4250 = vmatpush3.bf16.msra.mxu1 %v4247_v44  ;;  %3854 = vmatprep.mubr.f32.mxu1 %v1511_v29  ;;  %v4319_v29 = vpack.c.bf16 %v2172_v63, %v2165_v62 }
 0x186   :  { %4252 = vmatprep.subr.bf16.mxu1 %v4251_v21 }
 0x188   :  { %3855 = vmatmul.mubr.f32.gmra.mrb[2].mxu1 %v1521_v30 }
 0x189   :  { %4254 = vmatpush3.bf16.msra.mxu1 %v4251_v21  ;;  %3865 = vmatprep.mubr.f32.mxu1 %v4846_v61 }
 0x18a   :  { %4256 = vmatprep.subr.bf16.mxu1 %v4255_v31 }
 0x18c   :  { %3866 = vmatmul.mubr.f32.vlgmr.msra.gmra.mrb[0].mxu1 %v4855_v2 }
 0x18d   :  { %4258 = vmatpush3.bf16.msra.mxu1 %v4255_v31  ;;  %3868 = vmatprep.mubr.f32.mxu1 %v4864_v6  ;;  %v2701_v31 = vld [vmem:[%s5164_s7] sm:$0xff] }
 0x18e   :  { %4260 = vmatprep.subr.bf16.mxu1 %v4259_v15  ;;  %v2725_v35 = vand.u32 4294901760, %v2701_v31 }
 0x190   :  { %3869 = vmatmul.mubr.f32.gmra.mrb[2].mxu1 %v4884_v12  ;;  %v2835_v46 = vsub.f32 %v2701_v31, %v2725_v35 }
 0x191   :  { %4262 = vmatpush3.bf16.msra.mxu1 %v4259_v15  ;;  %3879 = vmatprep.mubr.f32.mxu1 %v4862_v5  ;;  %v2051_v5 = vsel %vm758_vm3, %v2035_v58, 0  ;;  %v2702_v15 = vld [vmem:[%s5164_s7 + $0x8] sm:$0xff]  ;;  %v2857_v58 = vand.u32 4294901760, %v2856_v54 }
 0x192   :  { %4264 = vmatprep.subr.bf16.mxu1 %v4870_v7  ;;  %v4996_v32 = vand.u32 4294901760, %v2051_v5  ;;  %v2728_v37 = vand.u32 4294901760, %v2702_v15  ;;  %v2836_v49 = vand.u32 4294901760, %v2835_v46 }
 0x194   :  { %3880 = vmatmul.mubr.f32.vlgmr.msra.gmra.mrb[0].mxu1 %v4880_v10  ;;  %v4992_v10 = vsub.f32 %v2045_v56, %v4967_v0  ;;  %v2842_v47 = vsub.f32 %v2702_v15, %v2728_v37  ;;  %v2837_v51 = vsub.f32 %v2835_v46, %v2836_v49 }
 0x195   :  { %4266 = vmatpush3.bf16.msra.mxu1 %v4870_v7  ;;  %3882 = vmatprep.mubr.f32.mxu1 %v4888_v14  ;;  %v5000_v14 = vsub.f32 %v2048_v57, %v4976_v4 }
 0x196   :  { %4268 = vmatprep.subr.bf16.mxu1 %v4893_v16  ;;  %v2134_v39 = vand.u32 4294901760, %v4992_v10  ;;  %v2843_v50 = vand.u32 4294901760, %v2842_v47  ;;  %v5081_v62 = vpack.c.bf16 %v2842_v47, %v2835_v46 }
 0x197   :  { %v2144_v36 = vand.u32 4294901760, %v5000_v14 }
 0x198   :  { %3883 = vmatmul.mubr.f32.gmra.mrb[2].mxu1 %v4904_v33  ;;  %v2135_v44 = vsub.f32 %v4992_v10, %v2134_v39  ;;  %v2844_v52 = vsub.f32 %v2842_v47, %v2843_v50 }
 0x199   :  { %4270 = vmatpush3.bf16.msra.mxu1 %v4893_v16  ;;  %3893 = vmatprep.mubr.f32.mxu1 %v1489_v13  ;;  %v2124_v13 = vand.u32 4294901760, %v4974_v3  ;;  %v2145_v23 = vsub.f32 %v5000_v14, %v2144_v36 }
 0x19a   :  { %4272 = vmatprep.subr.bf16.mxu1 %v4271_v34  ;;  %v2845_v56 = vand.u32 4294901760, %v2844_v52 }
 0x19b   :  { %v2146_v25 = vand.u32 4294901760, %v2145_v23 }
 0x19c   :  { %3894 = vmatmul.mubr.f32.vlgmr.msra.gmra.mrb[0].mxu1 %v1499_v20  ;;  %v2174_v20 = vand.u32 4294901760, %v2173_v9  ;;  %v3360_v9 = vld [vmem:[%s5165_s5] ss:$0 sm:$0xff] }
 0x19d   :  { %4274 = vmatpush3.bf16.msra.mxu1 %v4271_v34  ;;  %3896 = vmatprep.mubr.f32.mxu1 %v1509_v42  ;;  %v2703_v34 = vld [vmem:[%s5164_s7 + $0x10] sm:$0xff] }
 0x19e   :  { %4276 = vmatprep.subr.bf16.mxu1 %v4275_v45  ;;  %v4295_v42 = vpack.c.bf16 %v2174_v20, %v2167_v18  ;;  %v2731_v40 = vand.u32 4294901760, %v2703_v34 }
 0x1a0   :  { %3897 = vmatmul.mubr.f32.gmra.mrb[2].mxu1 %v1519_v19  ;;  %v5075_v48 = vpack.c.bf16 %v2734_v43, %v2731_v40  ;;  %v2849_v53 = vsub.f32 %v2703_v34, %v2731_v40 }
 0x1a1   :  { %4278 = vmatpush3.bf16.msra.mxu1 %v4275_v45  ;;  %3907 = vmatprep.mubr.f32.mxu1 %v4846_v61  ;;  %v5073_v45 = vpack.c.bf16 %v2728_v37, %v2725_v35 }
 0x1a2   :  { %4280 = vmatprep.subr.bf16.mxu1 %v4870_v7  ;;  %v2850_v57 = vand.u32 4294901760, %v2849_v53 }
 0x1a3   :  { %4336 = vmatprep.subr.bf16.mxu0 %v5073_v45 }
 0x1a4   :  { %3908 = vmatmul.mubr.f32.vlgmr.msra.gmra.mrb[0].mxu1 %v4855_v2  ;;  %4338 = vmatpush3.bf16.msra.mxu0 %v5073_v45  ;;  %v5087_v8 = vpack.c.bf16 %v2857_v58, %v2850_v57 }
 0x1a5   :  { %4282 = vmatpush3.bf16.msra.mxu1 %v4870_v7  ;;  %3910 = vmatprep.mubr.f32.mxu1 %v4864_v6  ;;  %v2186_v7 = vand.u32 4294901760, %v4971_v1 }
 0x1a6   :  { %4284 = vmatprep.subr.bf16.mxu1 %v4893_v16  ;;  %4340 = vmatprep.subr.bf16.mxu0 %v5075_v48 }
 0x1a7   :  { %v2187_v33 = vsub.f32 %v4971_v1, %v2186_v7  ;;  %v4323_v30 = vpack.c.bf16 %v2186_v7, %v2179_v11  ;;  %v3361_v11 = vld [vmem:[%s5166_s6] ss:$0 sm:$0xff] }
 0x1a8   :  { %3911 = vmatmul.mubr.f32.gmra.mrb[2].mxu1 %v4884_v12  ;;  %4342 = vmatpush3.bf16.msra.mxu0 %v5075_v48 }
 0x1a9   :  { %4286 = vmatpush3.bf16.msra.mxu1 %v4893_v16  ;;  %3921 = vmatprep.mubr.f32.mxu1 %v4846_v61  ;;  %v2153_v16 = vsub.f32 %v2051_v5, %v4996_v32  ;;  %v2125_v61 = vsub.f32 %v4974_v3, %v2124_v13  ;;  %v2188_v22 = vand.u32 4294901760, %v2187_v33 }
 0x1aa   :  { %4288 = vmatprep.subr.bf16.mxu1 %v4982_v60 }
 0x1ab   :  { %v2154_v24 = vand.u32 4294901760, %v2153_v16  ;;  %v2126_v19 = vand.u32 4294901760, %v2125_v61  ;;  %v4299_v26 = vpack.c.bf16 %v2188_v22, %v2181_v27 }
 0x1ac   :  { %3922 = vmatmul.mubr.f32.vlgmr.msra.gmra.mrb[0].mxu1 %v4855_v2  ;;  %v2136_v2 = vand.u32 4294901760, %v2135_v44 }
 0x1ad   :  { %4290 = vmatpush3.bf16.msra.mxu1 %v4982_v60  ;;  %3924 = vmatprep.mubr.f32.mxu1 %v4864_v6  ;;  %v2155_v6 = vsub.f32 %v2153_v16, %v2154_v24 }
 0x1ae   :  { %4292 = vmatprep.subr.bf16.mxu1 %v5005_v17 }
 0x1af   :  { %v2156_v21 = vand.u32 4294901760, %v2155_v6 }
 0x1b0   :  { %3925 = vmatmul.mubr.f32.gmra.mrb[2].mxu1 %v4884_v12  ;;  %v4307_v12 = vpack.c.bf16 %v4971_v1, %v4969_v59  ;;  %v2858_v59 = vsub.f32 %v2856_v54, %v2857_v58 }
 0x1b1   :  { %4294 = vmatpush3.bf16.msra.mxu1 %v5005_v17  ;;  %3935 = vmatprep.mubr.f32.mxu1 %v2126_v19 }
 0x1b2   :  { %4296 = vmatprep.subr.bf16.mxu1 %v4295_v42 }
 0x1b4   :  { %3936 = vmatmul.mubr.f32.vlgmr.msra.gmra.mrb[0].mxu1 %v2136_v2 }
 0x1b5   :  { %4298 = vmatpush3.bf16.msra.mxu1 %v4295_v42  ;;  %3938 = vmatprep.mubr.f32.mxu1 %v2146_v25 }
 0x1b6   :  { %4300 = vmatprep.subr.bf16.mxu1 %v4299_v26 }
 0x1b8   :  { %3939 = vmatmul.mubr.f32.gmra.mrb[2].mxu1 %v2156_v21 }
 0x1b9   :  { %4302 = vmatpush3.bf16.msra.mxu1 %v4299_v26  ;;  %3949 = vmatprep.mubr.f32.mxu1 %v4959_v55 }
 0x1ba   :  { %4304 = vmatprep.subr.bf16.mxu1 %v4303_v28 }
 0x1bc   :  { %3950 = vmatmul.mubr.f32.vlgmr.msra.gmra.mrb[0].mxu1 %v4967_v0 }
 0x1bd   :  { %4306 = vmatpush3.bf16.msra.mxu1 %v4303_v28  ;;  %3952 = vmatprep.mubr.f32.mxu1 %v4976_v4 }
 0x1be   :  { %4308 = vmatprep.subr.bf16.mxu1 %v4307_v12 }
 0x1c0   :  { %3953 = vmatmul.mubr.f32.gmra.mrb[2].mxu1 %v4996_v32 }
 0x1c1   :  { %4310 = vmatpush3.bf16.msra.mxu1 %v4307_v12  ;;  %3963 = vmatprep.mubr.f32.mxu1 %v4974_v3  ;;  %v2859_v3 = vand.u32 4294901760, %v2858_v59 }
 0x1c2   :  { %4312 = vmatprep.subr.bf16.mxu1 %v4982_v60 }
 0x1c4   :  { %3964 = vmatmul.mubr.f32.vlgmr.msra.gmra.mrb[0].mxu1 %v4992_v10 }
 0x1c5   :  { %4314 = vmatpush3.bf16.msra.mxu1 %v4982_v60  ;;  %3966 = vmatprep.mubr.f32.mxu1 %v5000_v14 }
 0x1c6   :  { %4316 = vmatprep.subr.bf16.mxu1 %v5005_v17 }
 0x1c8   :  { %3967 = vmatmul.mubr.f32.gmra.mrb[2].mxu1 %v2153_v16 }
 0x1c9   :  { %4318 = vmatpush3.bf16.msra.mxu1 %v5005_v17  ;;  %3977 = vmatprep.mubr.f32.mxu1 %v2124_v13 }
 0x1ca   :  { %4320 = vmatprep.subr.bf16.mxu1 %v4319_v29 }
 0x1cc   :  { %3978 = vmatmul.mubr.f32.vlgmr.msra.gmra.mrb[0].mxu1 %v2134_v39 }
 0x1cd   :  { %4322 = vmatpush3.bf16.msra.mxu1 %v4319_v29  ;;  %3980 = vmatprep.mubr.f32.mxu1 %v2144_v36 }
 0x1ce   :  { %4324 = vmatprep.subr.bf16.mxu1 %v4323_v30 }
 0x1d0   :  { %3981 = vmatmul.mubr.f32.gmra.mrb[2].mxu1 %v2154_v24 }
 0x1d1   :  { %4326 = vmatpush3.bf16.msra.mxu1 %v4323_v30  ;;  %3991 = vmatprep.mubr.f32.mxu1 %v4959_v55 }
 0x1d2   :  { %4328 = vmatprep.subr.bf16.mxu1 %v4982_v60 }
 0x1d4   :  { %3992 = vmatmul.mubr.f32.vlgmr.msra.gmra.mrb[0].mxu1 %v4967_v0 }
 0x1d5   :  { %4330 = vmatpush3.bf16.msra.mxu1 %v4982_v60  ;;  %3994 = vmatprep.mubr.f32.mxu1 %v4976_v4  ;;  %v5085_v60 = vpack.c.bf16 %v2843_v50, %v2836_v49  ;;  %v3362_v49 = vld [vmem:[%s5167_s8] ss:$0 sm:$0xff] }
 0x1d6   :  { %4332 = vmatprep.subr.bf16.mxu1 %v5005_v17 }
 0x1d8   :  { %3995 = vmatmul.mubr.f32.gmra.mrb[2].mxu1 %v4996_v32 }
 0x1d9   :  { %4334 = vmatpush3.bf16.msra.mxu1 %v5005_v17  ;;  %4005 = vmatprep.mubr.f32.mxu1 %v4959_v55  ;;  %v2838_v55 = vand.u32 4294901760, %v2837_v51 }
 0x1db   :  { %v4343_v63 = vpack.c.bf16 %v2845_v56, %v2838_v55 }
 0x1dc   :  { %4006 = vmatmul.mubr.f32.vlgmr.msra.gmra.mrb[0].mxu1 %v4967_v0  ;;  %v2851_v0 = vsub.f32 %v2849_v53, %v2850_v57 }
 0x1dd   :  { %4008 = vmatprep.mubr.f32.mxu1 %v4976_v4  ;;  %4344 = vmatprep.subr.bf16.mxu0 %v4343_v63  ;;  %v5083_v4 = vpack.c.bf16 %v2856_v54, %v2849_v53  ;;  %v4499_v53 = vld [vmem:[%s5159_s0 + $0x8] sm:$0xff] }
 0x1de   :  { %v2852_v1 = vand.u32 4294901760, %v2851_v0 }
 0x1e0   :  { %4009 = vmatmul.mubr.f32.gmra.mrb[2].mxu1 %v4996_v32  ;;  %v4347_v5 = vpack.c.bf16 %v2859_v3, %v2852_v1 }
 0x2af   :  { %v4007_v10 = vpop.f32.mrb[0].mxu1 }
 0x2b0   :  { %v2679_v7 = vadd.f32 %v4007_v10, %v3360_v9  ;;  %v2645_v32 = vpop.f32.mrb[1].mxu1 }
 0x2b1   :  { %v2678_v13 = vadd.f32 %v3360_v9, %v2645_v32 }
 0x2b2   :  { %vm2683_vm7 = vcmp.ge.f32.partialorder %v2679_v7, 0.0  ;;  %v2694_v14 = vmul.f32 %v3361_v11, %v2679_v7 }
 0x2b3   :  { %vm2682_vm8 = vcmp.ge.f32.partialorder %v2678_v13, 0.0  ;;  %v2693_v17 = vmul.f32 %v3361_v11, %v2678_v13  ;;  %v4010_v18 = vpop.f32.mrb[2].mxu1 }
 0x2b4   :  { %v2698_v20 = vsel %vm2683_vm7, %v2679_v7, %v2694_v14  ;;  %v2681_v39 = vadd.f32 %v4010_v18, %v3360_v9  ;;  %v2657_v41 = vpop.f32.mrb[3].mxu1 }
 0x2b5   :  { %v2716_v33 = vsel %vm758_vm3, %v2698_v20, 0  ;;  %v2697_v16 = vsel %vm2682_vm8, %v2678_v13, %v2693_v17  ;;  %v2680_v61 = vadd.f32 %v3360_v9, %v2657_v41 }
 0x2b6   :  { %v5096_v36 = vand.u32 4294901760, %v2716_v33  ;;  %v2713_v42 = vsel %vm758_vm3, %v2697_v16, 0  ;;  %vm2685_vm9 = vcmp.ge.f32.partialorder %v2681_v39, 0.0  ;;  %v2696_v44 = vmul.f32 %v3361_v11, %v2681_v39 }
 0x2b7   :  { %v5099_v27 = vand.u32 4294901760, %v2713_v42  ;;  %vm2684_vm10 = vcmp.ge.f32.partialorder %v2680_v61, 0.0  ;;  %v2695_v22 = vmul.f32 %v3361_v11, %v2680_v61 }
 0x2b8   :  { %v2804_v24 = vsub.f32 %v2716_v33, %v5096_v36  ;;  %v2700_v19 = vsel %vm2685_vm9, %v2681_v39, %v2696_v44 }
 0x2b9   :  { %v2794_v23 = vsub.f32 %v2713_v42, %v5099_v27  ;;  %v2722_v2 = vsel %vm758_vm3, %v2700_v19, 0  ;;  %v2699_v26 = vsel %vm2684_vm10, %v2680_v61, %v2695_v22 }
 0x2ba   :  { %v2805_v6 = vand.u32 4294901760, %v2804_v24  ;;  %v2823_v25 = vand.u32 4294901760, %v2722_v2  ;;  %v2719_v21 = vsel %vm758_vm3, %v2699_v26, 0 }
 0x2bb   :  { %v2813_v28 = vand.u32 4294901760, %v2719_v21  ;;  %v2795_v12 = vand.u32 4294901760, %v2794_v23 }
 0x2bc   :  { %v2806_v29 = vsub.f32 %v2804_v24, %v2805_v6  ;;  %v2824_v30 = vsub.f32 %v2722_v2, %v2823_v25 }
 0x2bd   :  { %v2814_v31 = vsub.f32 %v2719_v21, %v2813_v28  ;;  %v2796_v15 = vsub.f32 %v2794_v23, %v2795_v12 }
 0x2be   :  { %v2825_v34 = vand.u32 4294901760, %v2824_v30  ;;  %v2807_v38 = vand.u32 4294901760, %v2806_v29 }
 0x2bf   :  { %v2797_v35 = vand.u32 4294901760, %v2796_v15  ;;  %v2815_v37 = vand.u32 4294901760, %v2814_v31 }
 0x2c0   :  { %v2826_v40 = vsub.f32 %v2824_v30, %v2825_v34 }
 0x2c1   :  { %4019 = vmatprep.mubr.f32.mxu0 %v2797_v35  ;;  %v2816_v43 = vsub.f32 %v2814_v31, %v2815_v37 }
 0x2c2   :  { %4020 = vmatmul.mubr.f32.vlgmr.msra.gmra.mrb[4].mxu0 %v2807_v38  ;;  %v2827_v47 = vand.u32 4294901760, %v2826_v40 }
 0x2c3   :  { %4346 = vmatpush3.bf16.msra.mxu0 %v4343_v63  ;;  %v2817_v46 = vand.u32 4294901760, %v2816_v43 }
 0x2c4   :  { %4348 = vmatprep.subr.bf16.mxu0 %v4347_v5 }
 0x2c5   :  { %4022 = vmatprep.mubr.f32.mxu0 %v2817_v46 }
 0x2c6   :  { %4023 = vmatmul.mubr.f32.gmra.mrb[6].mxu0 %v2827_v47 }
 0x2c7   :  { %4350 = vmatpush3.bf16.msra.mxu0 %v4347_v5  ;;  %4033 = vmatprep.mubr.f32.mxu0 %v5099_v27 }
 0x2c8   :  { %4352 = vmatprep.subr.bf16.mxu0 %v5081_v62 }
 0x2ca   :  { %4034 = vmatmul.mubr.f32.vlgmr.msra.gmra.mrb[4].mxu0 %v5096_v36 }
 0x2cb   :  { %4354 = vmatpush3.bf16.msra.mxu0 %v5081_v62  ;;  %4036 = vmatprep.mubr.f32.mxu0 %v2813_v28 }
 0x2cc   :  { %4356 = vmatprep.subr.bf16.mxu0 %v5083_v4 }
 0x2ce   :  { %4037 = vmatmul.mubr.f32.gmra.mrb[6].mxu0 %v2823_v25 }
 0x2cf   :  { %4358 = vmatpush3.bf16.msra.mxu0 %v5083_v4  ;;  %4047 = vmatprep.mubr.f32.mxu0 %v2794_v23 }
 0x2d0   :  { %4360 = vmatprep.subr.bf16.mxu0 %v5073_v45 }
 0x2d2   :  { %4048 = vmatmul.mubr.f32.vlgmr.msra.gmra.mrb[4].mxu0 %v2804_v24 }
 0x2d3   :  { %4362 = vmatpush3.bf16.msra.mxu0 %v5073_v45  ;;  %4050 = vmatprep.mubr.f32.mxu0 %v2814_v31 }
 0x2d4   :  { %4364 = vmatprep.subr.bf16.mxu0 %v5075_v48 }
 0x2d6   :  { %4051 = vmatmul.mubr.f32.gmra.mrb[6].mxu0 %v2824_v30 }
 0x2d7   :  { %4366 = vmatpush3.bf16.msra.mxu0 %v5075_v48  ;;  %4061 = vmatprep.mubr.f32.mxu0 %v2795_v12 }
 0x2d8   :  { %4368 = vmatprep.subr.bf16.mxu0 %v5085_v60 }
 0x2da   :  { %4062 = vmatmul.mubr.f32.vlgmr.msra.gmra.mrb[4].mxu0 %v2805_v6 }
 0x2db   :  { %4370 = vmatpush3.bf16.msra.mxu0 %v5085_v60  ;;  %4064 = vmatprep.mubr.f32.mxu0 %v2815_v37 }
 0x2dc   :  { %4372 = vmatprep.subr.bf16.mxu0 %v5087_v8 }
 0x2de   :  { %4065 = vmatmul.mubr.f32.gmra.mrb[6].mxu0 %v2825_v34 }
 0x2df   :  { %4374 = vmatpush3.bf16.msra.mxu0 %v5087_v8  ;;  %4075 = vmatprep.mubr.f32.mxu0 %v5099_v27 }
 0x2e0   :  { %4376 = vmatprep.subr.bf16.mxu0 %v5073_v45 }
 0x2e2   :  { %4076 = vmatmul.mubr.f32.vlgmr.msra.gmra.mrb[4].mxu0 %v5096_v36 }
 0x2e3   :  { %4378 = vmatpush3.bf16.msra.mxu0 %v5073_v45  ;;  %4078 = vmatprep.mubr.f32.mxu0 %v2813_v28 }
 0x2e4   :  { %4380 = vmatprep.subr.bf16.mxu0 %v5075_v48 }
 0x2e6   :  { %4079 = vmatmul.mubr.f32.gmra.mrb[6].mxu0 %v2823_v25 }
 0x2e7   :  { %4382 = vmatpush3.bf16.msra.mxu0 %v5075_v48  ;;  %4089 = vmatprep.mubr.f32.mxu0 %v5099_v27  ;;  %v4500_v48 = vld [vmem:[%s5159_s0] sm:$0xff] }
 0x2ea   :  { %4090 = vmatmul.mubr.f32.vlgmr.msra.gmra.mrb[4].mxu0 %v5096_v36 }
 0x2eb   :  { %4092 = vmatprep.mubr.f32.mxu0 %v2813_v28 }
 0x2ee   :  { %4093 = vmatmul.mubr.f32.gmra.mrb[6].mxu0 %v2823_v25 }
 0x3bd   :  { %v4091_v50 = vpop.f32.mrb[4].mxu0 }
 0x3be   :  { %v4387_v51 = vadd.f32 %v4091_v50, %v3362_v49  ;;  %v3316_v52 = vpop.f32.mrb[5].mxu0 }
 0x3bf   :  { %v4388_v45 = vadd.f32 %v3362_v49, %v3316_v52 }
 0x3c0   :  { %v3339_v54 = vadd.f32 %v4499_v53, %v4387_v51 }
 0x3c1   :  { %v3338_v55 = vadd.f32 %v4500_v48, %v4388_v45  ;;  %v4094_v56 = vpop.f32.mrb[6].mxu0 }
 0x3c2   :  { %3343 = vst.msk [vmem:[%s5168_s10 + $0x8] sm:$0xff] %vm60_vm0, %v3339_v54  ;;  %v4389_v57 = vadd.f32 %v4094_v56, %v3362_v49  ;;  %v3328_v58 = vpop.f32.mrb[7].mxu0 }
 0x3c3   :  { %3342 = vst.msk [vmem:[%s5168_s10] sm:$0xff] %vm60_vm0, %v3338_v55  ;;  %v4390_v62 = vadd.f32 %v3362_v49, %v3328_v58 }
 0x3ca   :  { %v4501_v63 = vld [vmem:[%s5159_s0 + $0x18] sm:$0xff]  ;;  %v4502_v59 = vld [vmem:[%s5159_s0 + $0x10] sm:$0xff] }
 0x3cb   :  { %v3341_v0 = vadd.f32 %v4501_v63, %v4389_v57  ;;  %v3340_v1 = vadd.f32 %v4502_v59, %v4390_v62 }
 0x3cd   :  { %3345 = vst.msk [vmem:[%s5168_s10 + $0x18] sm:$0xff] %vm60_vm0, %v3341_v0  ;;  %3344 = vst.msk [vmem:[%s5168_s10 + $0x10] sm:$0xff] %vm60_vm0, %v3340_v1 }

</bundles_post_ra>
